<compile_context>
chip_gen: v5e
topology: v5e:2x2
jax: 0.10.0
libtpu: 0.0.40
codegen_flags: <defaults>
</compile_context>

<pallas_src>
import functools
import math

import jax
import jax.numpy as jnp
import numpy as np
from jax import lax
from jax.experimental import pallas as pl
from jax.experimental.pallas import tpu as pltpu

_LANE = 128
_TILE_M = 2048                 # lane-tile cap (VMEM-safe on v7x's 64 MiB)
_LRELU_SLOPE = 0.2
_FLRELU_SCALE = math.sqrt(2.0)
_INV_SQRT2 = 1.0 / math.sqrt(2.0)

# Set to jnp.bfloat16 on v6e/v7x to halve DMA bytes and double MXU rate
# (accumulation / epilogue stay f32).  Default f32 keeps the strict check.
_MXU_DTYPE = jnp.float32


def _round_up(x, m):
    return (x + m - 1) // m * m


# ---------------------------------------------------------------------------
# One-time parameter preparation (run OUTSIDE the jitted forward)
# ---------------------------------------------------------------------------
def _make_blur_kernel():
    """make_kernel((1,3,3,1)): normalized outer product.  upfirdn2d applies the
    flipped kernel; it is symmetric, so flipping is a numerical no-op."""
    k = np.array([1.0, 3.0, 3.0, 1.0])
    k2 = np.outer(k, k)
    k2 = k2 / k2.sum()
    return k2[::-1, ::-1].copy()


def _blur_pad(kernel_size, blur_len=4, factor=2):
    p = blur_len - factor + (kernel_size - 1)
    return (p + 1) // 2, p // 2


def _fold_blur_into_conv(w, blur_np):
    """Fold the Blur (4x4 FIR applied before) into an EqualConv2d weight:
    returns an equivalent (k+3)x(k+3) weight with the EqualConv2d scale
    (based on the ORIGINAL kernel size) already applied.  Pure numpy, runs
    once at parameter-preparation time."""
    c_out, c_in, k, _ = w.shape
    scale = 1.0 / math.sqrt(c_in * k * k)
    ws = np.asarray(w, np.float32) * scale
    kh, kw = blur_np.shape
    ke = k + kh - 1
    w_eff = np.zeros((c_out, c_in, ke, ke), np.float32)
    for i in range(kh):
        for j in range(kw):
            w_eff[:, :, i:i + k, j:j + k] += ws * float(blur_np[i, j])
    return jnp.asarray(w_eff)


def prepare_params(params):
    """Fold blur into stride-2 conv weights, apply EqualConv2d scales and
    flatten every weight to its (C_out, K) matmul form.  Call once; the
    jitted forward consumes the result."""
    blur = _make_blur_kernel()

    def conv_mat(w, scale=None):
        c_out, c_in, kh, kw = w.shape
        if scale is None:
            scale = 1.0 / math.sqrt(c_in * kh * kw)
        return (jnp.transpose(w, (0, 2, 3, 1)).reshape(c_out, kh * kw * c_in)
                .astype(jnp.float32) * jnp.float32(scale))

    def col(b):
        return b.reshape(-1, 1).astype(jnp.float32)

    def block(p):
        return {
            "w1": conv_mat(p["conv1_w"]),
            "b1": col(p["conv1_b"]),
            "w2": conv_mat(_fold_blur_into_conv(p["conv2_w"], blur), scale=1.0),
            "b2": col(p["conv2_b"]),
            "ws": conv_mat(_fold_blur_into_conv(p["skip_w"], blur), scale=1.0),
        }

    return {
        "rb1": block(params["rb1"]),
        "rb2": block(params["rb2"]),
        "rb3": block(params["rb3"]),
        "head": {
            "w_str1": conv_mat(params["str1_w"]),
            "b_str1": col(params["str1_b"]),
            "w_str2": conv_mat(params["str2_w"]),
            "b_str2": col(params["str2_b"]),
        },
    }


# ---------------------------------------------------------------------------
# Tiling helpers
# ---------------------------------------------------------------------------
def _lane_tiles(m, streamed_rows):
    """Pick (padded M, lane tile) so there are >=2 'parallel' grid steps when
    possible (v7x dual TensorCore) while the double-buffered streamed blocks
    stay well under the scoped-VMEM default on every generation."""
    mp = _round_up(max(m, _LANE), _LANE)
    if mp == _LANE:
        return mp, mp
    tm = min(_TILE_M, _round_up(pl.cdiv(mp, 2), _LANE))
    budget = 8 * 1024 * 1024          # 2x-buffered f32 streamed blocks
    while tm > _LANE and 2 * 4 * streamed_rows * tm > budget:
        tm = _round_up(tm // 2, _LANE)
    mp = _round_up(mp, tm)
    return mp, tm


def _compiler_params(vmem_bytes_needed):
    limit = None
    if vmem_bytes_needed > 12 * 1024 * 1024:   # only raise when actually needed
        limit = min(100 * 1024 * 1024,
                    _round_up(vmem_bytes_needed + (4 << 20), 1 << 20))
    return pltpu.CompilerParams(dimension_semantics=("parallel",),
                                vmem_limit_bytes=limit)


def _im2col(xp, kh, kw, stride):
    """Lane-dense im2col of a pre-padded channel-major tensor.
    xp: (C, N, Hp, Wp) -> (kh*kw*C, N*Ho*Wo) with row order (ky, kx, ci)."""
    c, n, hp, wp = xp.shape
    ho = (hp - kh) // stride + 1
    wo = (wp - kw) // stride + 1
    taps = []
    for ky in range(kh):
        for kx in range(kw):
            taps.append(lax.slice(
                xp, (0, 0, ky, kx),
                (c, n, ky + (ho - 1) * stride + 1, kx + (wo - 1) * stride + 1),
                (1, 1, stride, stride)))
    return jnp.stack(taps, axis=0).reshape(kh * kw * c, n * ho * wo)


# ---------------------------------------------------------------------------
# Pallas kernels
# ---------------------------------------------------------------------------
def _conv_act_kernel(w_ref, p_ref, b_ref, o_ref):
    # (C_out, K) @ (K, tm) on the MXU, f32 accumulation; M is the lane axis.
    acc = jnp.dot(w_ref[...], p_ref[...], preferred_element_type=jnp.float32)
    acc = acc + b_ref[...]                                         # (C_out,1) bcast
    acc = jnp.where(acc >= 0.0, acc, _LRELU_SLOPE * acc) * jnp.float32(_FLRELU_SCALE)
    o_ref[...] = acc.astype(o_ref.dtype)


def _block_tail_kernel(*refs, with_structure):
    """conv2 (blur folded) + FusedLeakyReLU, skip conv, residual epilogue, and
    optionally the two 1x1 structure convs — all on VMEM-resident values."""
    if with_structure:
        (w2_ref, p2_ref, b2_ref, ws_ref, ps_ref,
         w1s_ref, b1s_ref, w2s_ref, b2s_ref, s_ref, st_ref) = refs
    else:
        w2_ref, p2_ref, b2_ref, ws_ref, ps_ref, s_ref = refs

    y = jnp.dot(w2_ref[...], p2_ref[...], preferred_element_type=jnp.float32)
    y = y + b2_ref[...]
    y = jnp.where(y >= 0.0, y, _LRELU_SLOPE * y) * jnp.float32(_FLRELU_SCALE)

    sk = jnp.dot(ws_ref[...], ps_ref[...], preferred_element_type=jnp.float32)
    s = (y + sk) * jnp.float32(_INV_SQRT2)
    s_ref[...] = s.astype(s_ref.dtype)

    if with_structure:
        t = jnp.dot(w1s_ref[...], s, preferred_element_type=jnp.float32) + b1s_ref[...]
        t = jnp.where(t >= 0.0, t, _LRELU_SLOPE * t) * jnp.float32(_FLRELU_SCALE)
        t = jnp.dot(w2s_ref[...], t, preferred_element_type=jnp.float32) + b2s_ref[...]
        t = jnp.where(t >= 0.0, t, _LRELU_SLOPE * t) * jnp.float32(_FLRELU_SCALE)
        st_ref[...] = t.astype(st_ref.dtype)


# ---------------------------------------------------------------------------
# pallas_call wrappers
# ---------------------------------------------------------------------------
def _conv_act(w_mat, bias, patches):
    """One conv layer: matmul + bias + FusedLeakyReLU.  Returns (C_out, M)."""
    c_out, k = w_mat.shape
    _, m = patches.shape
    mp, tm = _lane_tiles(m, k + c_out)
    p = patches if mp == m else jnp.pad(patches, ((0, 0), (0, mp - m)))

    out = pl.pallas_call(
        _conv_act_kernel,
        out_shape=jax.ShapeDtypeStruct((c_out, mp), jnp.float32),
        grid_spec=pltpu.PrefetchScalarGridSpec(
            num_scalar_prefetch=0, grid=(mp // tm,),
            in_specs=[pl.BlockSpec((c_out, k), lambda i: (0, 0)),
                      pl.BlockSpec((k, tm), lambda i: (0, i)),
                      pl.BlockSpec((c_out, 1), lambda i: (0, 0))],
            out_specs=pl.BlockSpec((c_out, tm), lambda i: (0, i))),
        compiler_params=_compiler_params(2 * 4 * (k + c_out) * tm + 4 * c_out * (k + 1)),
        cost_estimate=pl.CostEstimate(
            flops=2 * c_out * k * mp, transcendentals=0,
            bytes_accessed=4 * (c_out * k + k * mp + c_out + c_out * mp)),
    )(w_mat.astype(_MXU_DTYPE), p.astype(_MXU_DTYPE), bias)
    return out[:, :m]


def _block_tail(bp, p2, ps, head=None):
    """Fused conv2 + skip + residual (+ optional structure head)."""
    c_out, k2 = bp["w2"].shape
    ks = bp["ws"].shape[1]
    _, m = p2.shape
    c_str = head["w_str2"].shape[0] if head is not None else 0
    streamed = k2 + ks + c_out + c_str
    mp, tm = _lane_tiles(m, streamed)
    if mp != m:
        p2 = jnp.pad(p2, ((0, 0), (0, mp - m)))
        ps = jnp.pad(ps, ((0, 0), (0, mp - m)))

    inputs = [bp["w2"].astype(_MXU_DTYPE), p2.astype(_MXU_DTYPE), bp["b2"],
              bp["ws"].astype(_MXU_DTYPE), ps.astype(_MXU_DTYPE)]
    in_specs = [pl.BlockSpec((c_out, k2), lambda i: (0, 0)),
                pl.BlockSpec((k2, tm), lambda i: (0, i)),
                pl.BlockSpec((c_out, 1), lambda i: (0, 0)),
                pl.BlockSpec((c_out, ks), lambda i: (0, 0)),
                pl.BlockSpec((ks, tm), lambda i: (0, i))]
    flops = 2 * mp * (c_out * k2 + c_out * ks)

    if head is not None:
        c_hid = head["w_str1"].shape[0]
        inputs += [head["w_str1"], head["b_str1"], head["w_str2"], head["b_str2"]]
        in_specs += [pl.BlockSpec((c_hid, c_hid), lambda i: (0, 0)),
                     pl.BlockSpec((c_hid, 1), lambda i: (0, 0)),
                     pl.BlockSpec((c_str, c_hid), lambda i: (0, 0)),
                     pl.BlockSpec((c_str, 1), lambda i: (0, 0))]
        out_shape = (jax.ShapeDtypeStruct((c_out, mp), jnp.float32),
                     jax.ShapeDtypeStruct((c_str, mp), jnp.float32))
        out_specs = (pl.BlockSpec((c_out, tm), lambda i: (0, i)),
                     pl.BlockSpec((c_str, tm), lambda i: (0, i)))
        flops += 2 * mp * (c_hid * c_hid + c_str * c_hid)
    else:
        out_shape = jax.ShapeDtypeStruct((c_out, mp), jnp.float32)
        out_specs = pl.BlockSpec((c_out, tm), lambda i: (0, i))

    bytes_accessed = (4 * sum(int(np.prod(a.shape)) for a in inputs)
                      + 4 * (c_out + c_str) * mp)
    kernel = functools.partial(_block_tail_kernel, with_structure=head is not None)

    res = pl.pallas_call(
        kernel,
        out_shape=out_shape,
        grid_spec=pltpu.PrefetchScalarGridSpec(
            num_scalar_prefetch=0, grid=(mp // tm,),
            in_specs=in_specs, out_specs=out_specs),
        compiler_params=_compiler_params(2 * 4 * streamed * tm),
        cost_estimate=pl.CostEstimate(flops=flops, transcendentals=0,
                                      bytes_accessed=bytes_accessed),
    )(*inputs)

    if head is not None:
        return res[0][:, :m], res[1][:, :m]
    return res[:, :m]


# ---------------------------------------------------------------------------
# Model forward (Pallas path), activations kept channel-major (C, N, H, W)
# ---------------------------------------------------------------------------
def _resblock(x, bp, head=None):
    c_in, n, h, w = x.shape
    c_out = bp["w1"].shape[0]

    # conv1: ReflectionPad(1) -> 3x3 s1 EqualConv2d -> FusedLeakyReLU
    xr = jnp.pad(x, ((0, 0), (0, 0), (1, 1), (1, 1)), mode="reflect")
    out1 = _conv_act(bp["w1"], bp["b1"], _im2col(xr, 3, 3, 1)).reshape(c_out, n, h, w)

    # conv2: Blur(pad 2,2)+3x3 s2 folded into one 6x6 s2 conv on zero-padded input
    pc0, pc1 = _blur_pad(3)
    o2p = jnp.pad(out1, ((0, 0), (0, 0), (pc0, pc1), (pc0, pc1)))
    p2 = _im2col(o2p, 6, 6, 2)

    # skip: Blur(pad 1,1)+1x1 s2 folded into one 4x4 s2 conv on the block input
    ps0, ps1 = _blur_pad(1)
    xsp = jnp.pad(x, ((0, 0), (0, 0), (ps0, ps1), (ps0, ps1)))
    ps = _im2col(xsp, 4, 4, 2)

    ho, wo = h // 2, w // 2
    res = _block_tail(bp, p2, ps, head=head)
    if head is None:
        return res.reshape(c_out, n, ho, wo)
    s, st = res
    return s.reshape(c_out, n, ho, wo), st.reshape(-1, n, ho, wo)


@functools.partial(jax.jit, static_argnames=("multi_out",))
def cifar_str_branch_forward(x_nchw, prep, multi_out=False):
    xc = jnp.transpose(x_nchw, (1, 0, 2, 3)).astype(jnp.float32)  # -> (C,N,H,W)
    s1 = _resblock(xc, prep["rb1"])
    s2 = _resblock(s1, prep["rb2"])
    s3, st = _resblock(s2, prep["rb3"], head=prep["head"])
    to_nchw = lambda t: jnp.transpose(t, (1, 0, 2, 3))
    if multi_out:
        return to_nchw(s1), to_nchw(s2), to_nchw(s3), to_nchw(st)
    return to_nchw(st)


# ---------------------------------------------------------------------------
# Pure-JAX reference reproducing the PyTorch forward, for validation.
# ---------------------------------------------------------------------------
def _blur_ref(x, blur_np, pad):
    c = x.shape[1]
    k = jnp.tile(jnp.asarray(blur_np, jnp.float32)[None, None], (c, 1, 1, 1))
    return lax.conv_general_dilated(
        x, k, (1, 1), [(pad[0], pad[1]), (pad[0], pad[1])],
        dimension_numbers=("NCHW", "OIHW", "NCHW"),
        feature_group_count=c, precision=lax.Precision.HIGHEST)


def _equal_conv2d_ref(x, w, stride, padding):
    c_in, k = w.shape[1], w.shape[2]
    scale = 1.0 / math.sqrt(c_in * k * k)
    return lax.conv_general_dilated(
        x, w * scale, (stride, stride),
        [(padding, padding), (padding, padding)],
        dimension_numbers=("NCHW", "OIHW", "NCHW"),
        precision=lax.Precision.HIGHEST)


def _fused_lrelu_ref(x, b):
    y = x + b.reshape(1, -1, 1, 1)
    return jnp.where(y >= 0.0, y, _LRELU_SLOPE * y) * _FLRELU_SCALE


def _conv_layer_ref(x, w, b, blur_np, *, downsample=False, padding="zero",
                    activate=True):
    k = w.shape[2]
    if downsample:
        x = _blur_ref(x, blur_np, _blur_pad(k))
        stride, conv_pad = 2, 0
    else:
        stride = 1
        if padding == "reflect":
            rp = (k - 1) // 2
            if rp > 0:
                x = jnp.pad(x, ((0, 0), (0, 0), (rp, rp), (rp, rp)), mode="reflect")
            conv_pad = 0
        elif padding == "zero":
            conv_pad = (k - 1) // 2
        else:
            conv_pad = 0
    y = _equal_conv2d_ref(x, w, stride, conv_pad)
    if activate:
        y = _fused_lrelu_ref(y, b)
    return y


def _resblock_ref(x, p, blur_np):
    out = _conv_layer_ref(x, p["conv1_w"], p["conv1_b"], blur_np, padding="reflect")
    out = _conv_layer_ref(out, p["conv2_w"], p["conv2_b"], blur_np,
                          downsample=True, padding="reflect")
    skip = _conv_layer_ref(x, p["skip_w"], None, blur_np,
                           downsample=True, activate=False)
    return (out + skip) / math.sqrt(2.0)


def cifar_str_branch_ref(x, params, multi_out=False):
    blur_np = _make_blur_kernel()
    s1 = _resblock_ref(x, params["rb1"], blur_np)
    s2 = _resblock_ref(s1, params["rb2"], blur_np)
    s3 = _resblock_ref(s2, params["rb3"], blur_np)
    st = _conv_layer_ref(s3, params["str1_w"], params["str1_b"], blur_np)
    st = _conv_layer_ref(st, params["str2_w"], params["str2_b"], blur_np)
    if multi_out:
        return s1, s2, s3, st
    return st


# ---------------------------------------------------------------------------
# Deterministic example
# ---------------------------------------------------------------------------
def _init_params(key, channel, structure_channel):
    ks = iter(jax.random.split(key, 32))

    def nrm(shape, s=1.0):
        return jax.random.normal(next(ks), shape, jnp.float32) * s

    def resblock_params(c_in, c_out):
        return {
            "conv1_w": nrm((c_out, c_in, 3, 3)),
            "conv1_b": nrm((c_out,), 0.5),
            "conv2_w": nrm((c_out, c_out, 3, 3)),
            "conv2_b": nrm((c_out,), 0.5),
            "skip_w": nrm((c_out, c_in, 1, 1)),
        }

    c = channel
    return {
        "rb1": resblock_params(c, c),
        "rb2": resblock_params(c, 2 * c),
        "rb3": resblock_params(2 * c, 4 * c),
        "str1_w": nrm((4 * c, 4 * c, 1, 1)),
        "str1_b": nrm((4 * c,), 0.5),
        "str2_w": nrm((structure_channel, 4 * c, 1, 1)),
        "str2_b": nrm((structure_channel,), 0.5),
    }


if __name__ == "__main__":
    key = jax.random.PRNGKey(0)
    k_params, k_x = jax.random.split(key)

    N, channel, H, W = 2, 4, 16, 16
    structure_channel = 8

    params = _init_params(k_params, channel, structure_channel)
    x = jax.random.normal(k_x, (N, channel, H, W), dtype=jnp.float32)

    prep = prepare_params(params)                 # one-time, outside jit

    outs = cifar_str_branch_forward(x, prep, multi_out=True)
    outs = jax.block_until_ready(outs)
    refs = cifar_str_branch_ref(x, params, multi_out=True)

    expected = [(N, channel, 8, 8), (N, 2 * channel, 4, 4),
                (N, 4 * channel, 2, 2), (N, structure_channel, 2, 2)]
    names = ["scale1", "scale2", "scale3", "structure"]
    for name, o, r, es in zip(names, outs, refs, expected):
        assert o.shape == es, f"{name}: shape {o.shape} != {es}"
        assert jnp.allclose(o, r, atol=2e-3, rtol=2e-3), (
            f"{name}: max abs err {jnp.max(jnp.abs(o - r))}")

    # Also exercise multi_out=False (returns only `structure`).
    st_only = jax.block_until_ready(
        cifar_str_branch_forward(x, prep, multi_out=False))
    assert jnp.allclose(st_only, outs[3], atol=1e-5, rtol=1e-5)

    print("KERNEL_OK")
</pallas_src>

<mosaic_0001>
module attributes {stable_mosaic.version = 11 : i64} {
  func.func @_conv_act_kernel(%arg0: i32, %arg1: memref<4x36xf32, #tpu.memory_space<vmem>>, %arg2: memref<36x256xf32, #tpu.memory_space<vmem>>, %arg3: memref<4x1xf32, #tpu.memory_space<vmem>>, %arg4: memref<4x256xf32, #tpu.memory_space<vmem>>) attributes {dimension_semantics = [#tpu.dimension_semantics<parallel>], iteration_bounds = array<i64: 2>, scalar_prefetch = 0 : i64, scratch_operands = 0 : i64, tpu.core_type = #tpu.core_type<tc>, window_params = [{pipeline_mode = #tpu.pipeline_mode<synchronous>, transform_indices = @transform_0, window_bounds = array<i64: 4, 36>}, {transform_indices = @transform_1, window_bounds = array<i64: 36, 256>}, {pipeline_mode = #tpu.pipeline_mode<synchronous>, transform_indices = @transform_2, window_bounds = array<i64: 4, 1>}, {transform_indices = @transform_3, window_bounds = array<i64: 4, 256>}]} {
    %c0 = arith.constant 0 : index
    %c0_0 = arith.constant 0 : index
    %0 = vector.load %arg1[%c0, %c0_0] : memref<4x36xf32, #tpu.memory_space<vmem>>, vector<4x36xf32>
    %c0_1 = arith.constant 0 : index
    %c0_2 = arith.constant 0 : index
    %1 = vector.load %arg2[%c0_1, %c0_2] : memref<36x256xf32, #tpu.memory_space<vmem>>, vector<36x256xf32>
    %cst = arith.constant dense<0.000000e+00> : vector<4x256xf32>
    %2 = tpu.matmul %0, %1, %cst {dimension_numbers = #tpu.dot_dimension_numbers<[1], [0], [0], [1], [0, 0, 1, 1], [], []>} : vector<4x36xf32>, vector<36x256xf32>, vector<4x256xf32> -> vector<4x256xf32>
    %c0_3 = arith.constant 0 : index
    %c0_4 = arith.constant 0 : index
    %3 = vector.load %arg3[%c0_3, %c0_4] : memref<4x1xf32, #tpu.memory_space<vmem>>, vector<4x1xf32>
    %4 = vector.broadcast %3 : vector<4x1xf32> to vector<4x256xf32>
    %5 = arith.addf %2, %4 : vector<4x256xf32>
    %cst_5 = arith.constant 0.000000e+00 : f32
    %6 = vector.broadcast %cst_5 : f32 to vector<4x256xf32>
    %7 = arith.cmpf oge, %5, %6 : vector<4x256xf32>
    %cst_6 = arith.constant 2.000000e-01 : f32
    %8 = vector.broadcast %cst_6 : f32 to vector<4x256xf32>
    %9 = arith.mulf %8, %5 : vector<4x256xf32>
    %10 = arith.select %7, %5, %9 : vector<4x256xi1>, vector<4x256xf32>
    %cst_7 = arith.constant 1.41421354 : f32
    %11 = vector.broadcast %cst_7 : f32 to vector<4x256xf32>
    %12 = arith.mulf %10, %11 : vector<4x256xf32>
    %c0_8 = arith.constant 0 : index
    %c0_9 = arith.constant 0 : index
    %13 = vector.load %arg4[%c0_8, %c0_9] : memref<4x256xf32, #tpu.memory_space<vmem>>, vector<4x256xf32>
    tpu.vector_store %arg4[%c0_8, %c0_9], %12 {strides = array<i32>} : memref<4x256xf32, #tpu.memory_space<vmem>>, vector<4x256xf32>,
    return
  }
  func.func @transform_0(%arg0: i32) -> (i32, i32) {
    %c0_i32 = arith.constant 0 : i32
    %c0_i32_0 = arith.constant 0 : i32
    %c0_i32_1 = arith.constant 0 : i32
    return %c0_i32, %c0_i32_0 : i32, i32
  }
  func.func @transform_1(%arg0: i32) -> (i32, i32) {
    %c0_i32 = arith.constant 0 : i32
    %c0_i32_0 = arith.constant 0 : i32
    return %c0_i32, %arg0 : i32, i32
  }
  func.func @transform_2(%arg0: i32) -> (i32, i32) {
    %c0_i32 = arith.constant 0 : i32
    %c0_i32_0 = arith.constant 0 : i32
    %c0_i32_1 = arith.constant 0 : i32
    return %c0_i32, %c0_i32_0 : i32, i32
  }
  func.func @transform_3(%arg0: i32) -> (i32, i32) {
    %c0_i32 = arith.constant 0 : i32
    %c0_i32_0 = arith.constant 0 : i32
    return %c0_i32, %arg0 : i32, i32
  }
}

module attributes {stable_mosaic.version = 11 : i64} {
  func.func @_block_tail_kernel(%arg0: i32, %arg1: memref<4x144xf32, #tpu.memory_space<vmem>>, %arg2: memref<144x128xf32, #tpu.memory_space<vmem>>, %arg3: memref<4x1xf32, #tpu.memory_space<vmem>>, %arg4: memref<4x64xf32, #tpu.memory_space<vmem>>, %arg5: memref<64x128xf32, #tpu.memory_space<vmem>>, %arg6: memref<4x128xf32, #tpu.memory_space<vmem>>) attributes {dimension_semantics = [#tpu.dimension_semantics<parallel>], iteration_bounds = array<i64: 1>, scalar_prefetch = 0 : i64, scratch_operands = 0 : i64, tpu.core_type = #tpu.core_type<tc>, window_params = [{pipeline_mode = #tpu.pipeline_mode<synchronous>, transform_indices = @transform_0, window_bounds = array<i64: 4, 144>}, {transform_indices = @transform_1, window_bounds = array<i64: 144, 128>}, {pipeline_mode = #tpu.pipeline_mode<synchronous>, transform_indices = @transform_2, window_bounds = array<i64: 4, 1>}, {pipeline_mode = #tpu.pipeline_mode<synchronous>, transform_indices = @transform_3, window_bounds = array<i64: 4, 64>}, {transform_indices = @transform_4, window_bounds = array<i64: 64, 128>}, {transform_indices = @transform_5, window_bounds = array<i64: 4, 128>}]} {
    %c0 = arith.constant 0 : index
    %c0_0 = arith.constant 0 : index
    %0 = vector.load %arg1[%c0, %c0_0] : memref<4x144xf32, #tpu.memory_space<vmem>>, vector<4x144xf32>
    %c0_1 = arith.constant 0 : index
    %c0_2 = arith.constant 0 : index
    %1 = vector.load %arg2[%c0_1, %c0_2] : memref<144x128xf32, #tpu.memory_space<vmem>>, vector<144x128xf32>
    %cst = arith.constant dense<0.000000e+00> : vector<4x128xf32>
    %2 = tpu.matmul %0, %1, %cst {dimension_numbers = #tpu.dot_dimension_numbers<[1], [0], [0], [1], [0, 0, 1, 1], [], []>} : vector<4x144xf32>, vector<144x128xf32>, vector<4x128xf32> -> vector<4x128xf32>
    %c0_3 = arith.constant 0 : index
    %c0_4 = arith.constant 0 : index
    %3 = vector.load %arg3[%c0_3, %c0_4] : memref<4x1xf32, #tpu.memory_space<vmem>>, vector<4x1xf32>
    %4 = vector.broadcast %3 : vector<4x1xf32> to vector<4x128xf32>
    %5 = arith.addf %2, %4 : vector<4x128xf32>
    %cst_5 = arith.constant 0.000000e+00 : f32
    %6 = vector.broadcast %cst_5 : f32 to vector<4x128xf32>
    %7 = arith.cmpf oge, %5, %6 : vector<4x128xf32>
    %cst_6 = arith.constant 2.000000e-01 : f32
    %8 = vector.broadcast %cst_6 : f32 to vector<4x128xf32>
    %9 = arith.mulf %8, %5 : vector<4x128xf32>
    %10 = arith.select %7, %5, %9 : vector<4x128xi1>, vector<4x128xf32>
    %cst_7 = arith.constant 1.41421354 : f32
    %11 = vector.broadcast %cst_7 : f32 to vector<4x128xf32>
    %12 = arith.mulf %10, %11 : vector<4x128xf32>
    %c0_8 = arith.constant 0 : index
    %c0_9 = arith.constant 0 : index
    %13 = vector.load %arg4[%c0_8, %c0_9] : memref<4x64xf32, #tpu.memory_space<vmem>>, vector<4x64xf32>
    %c0_10 = arith.constant 0 : index
    %c0_11 = arith.constant 0 : index
    %14 = vector.load %arg5[%c0_10, %c0_11] : memref<64x128xf32, #tpu.memory_space<vmem>>, vector<64x128xf32>
    %cst_12 = arith.constant dense<0.000000e+00> : vector<4x128xf32>
    %15 = tpu.matmul %13, %14, %cst_12 {dimension_numbers = #tpu.dot_dimension_numbers<[1], [0], [0], [1], [0, 0, 1, 1], [], []>} : vector<4x64xf32>, vector<64x128xf32>, vector<4x128xf32> -> vector<4x128xf32>
    %16 = arith.addf %12, %15 : vector<4x128xf32>
    %cst_13 = arith.constant 0.707106769 : f32
    %17 = vector.broadcast %cst_13 : f32 to vector<4x128xf32>
    %18 = arith.mulf %16, %17 : vector<4x128xf32>
    %c0_14 = arith.constant 0 : index
    %c0_15 = arith.constant 0 : index
    %19 = vector.load %arg6[%c0_14, %c0_15] : memref<4x128xf32, #tpu.memory_space<vmem>>, vector<4x128xf32>
    tpu.vector_store %arg6[%c0_14, %c0_15], %18 {strides = array<i32>} : memref<4x128xf32, #tpu.memory_space<vmem>>, vector<4x128xf32>,
    return
  }
  func.func @transform_0(%arg0: i32) -> (i32, i32) {
    %c0_i32 = arith.constant 0 : i32
    %c0_i32_0 = arith.constant 0 : i32
    %c0_i32_1 = arith.constant 0 : i32
    return %c0_i32, %c0_i32_0 : i32, i32
  }
  func.func @transform_1(%arg0: i32) -> (i32, i32) {
    %c0_i32 = arith.constant 0 : i32
    %c0_i32_0 = arith.constant 0 : i32
    return %c0_i32, %arg0 : i32, i32
  }
  func.func @transform_2(%arg0: i32) -> (i32, i32) {
    %c0_i32 = arith.constant 0 : i32
    %c0_i32_0 = arith.constant 0 : i32
    %c0_i32_1 = arith.constant 0 : i32
    return %c0_i32, %c0_i32_0 : i32, i32
  }
  func.func @transform_3(%arg0: i32) -> (i32, i32) {
    %c0_i32 = arith.constant 0 : i32
    %c0_i32_0 = arith.constant 0 : i32
    %c0_i32_1 = arith.constant 0 : i32
    return %c0_i32, %c0_i32_0 : i32, i32
  }
  func.func @transform_4(%arg0: i32) -> (i32, i32) {
    %c0_i32 = arith.constant 0 : i32
    %c0_i32_0 = arith.constant 0 : i32
    return %c0_i32, %arg0 : i32, i32
  }
  func.func @transform_5(%arg0: i32) -> (i32, i32) {
    %c0_i32 = arith.constant 0 : i32
    %c0_i32_0 = arith.constant 0 : i32
    return %c0_i32, %arg0 : i32, i32
  }
}

module attributes {stable_mosaic.version = 11 : i64} {
  func.func @_conv_act_kernel(%arg0: i32, %arg1: memref<8x36xf32, #tpu.memory_space<vmem>>, %arg2: memref<36x128xf32, #tpu.memory_space<vmem>>, %arg3: memref<8x1xf32, #tpu.memory_space<vmem>>, %arg4: memref<8x128xf32, #tpu.memory_space<vmem>>) attributes {dimension_semantics = [#tpu.dimension_semantics<parallel>], iteration_bounds = array<i64: 1>, scalar_prefetch = 0 : i64, scratch_operands = 0 : i64, tpu.core_type = #tpu.core_type<tc>, window_params = [{pipeline_mode = #tpu.pipeline_mode<synchronous>, transform_indices = @transform_0, window_bounds = array<i64: 8, 36>}, {transform_indices = @transform_1, window_bounds = array<i64: 36, 128>}, {pipeline_mode = #tpu.pipeline_mode<synchronous>, transform_indices = @transform_2, window_bounds = array<i64: 8, 1>}, {transform_indices = @transform_3, window_bounds = array<i64: 8, 128>}]} {
    %c0 = arith.constant 0 : index
    %c0_0 = arith.constant 0 : index
    %0 = vector.load %arg1[%c0, %c0_0] : memref<8x36xf32, #tpu.memory_space<vmem>>, vector<8x36xf32>
    %c0_1 = arith.constant 0 : index
    %c0_2 = arith.constant 0 : index
    %1 = vector.load %arg2[%c0_1, %c0_2] : memref<36x128xf32, #tpu.memory_space<vmem>>, vector<36x128xf32>
    %cst = arith.constant dense<0.000000e+00> : vector<8x128xf32>
    %2 = tpu.matmul %0, %1, %cst {dimension_numbers = #tpu.dot_dimension_numbers<[1], [0], [0], [1], [0, 0, 1, 1], [], []>} : vector<8x36xf32>, vector<36x128xf32>, vector<8x128xf32> -> vector<8x128xf32>
    %c0_3 = arith.constant 0 : index
    %c0_4 = arith.constant 0 : index
    %3 = vector.load %arg3[%c0_3, %c0_4] : memref<8x1xf32, #tpu.memory_space<vmem>>, vector<8x1xf32>
    %4 = vector.broadcast %3 : vector<8x1xf32> to vector<8x128xf32>
    %5 = arith.addf %2, %4 : vector<8x128xf32>
    %cst_5 = arith.constant 0.000000e+00 : f32
    %6 = vector.broadcast %cst_5 : f32 to vector<8x128xf32>
    %7 = arith.cmpf oge, %5, %6 : vector<8x128xf32>
    %cst_6 = arith.constant 2.000000e-01 : f32
    %8 = vector.broadcast %cst_6 : f32 to vector<8x128xf32>
    %9 = arith.mulf %8, %5 : vector<8x128xf32>
    %10 = arith.select %7, %5, %9 : vector<8x128xi1>, vector<8x128xf32>
    %cst_7 = arith.constant 1.41421354 : f32
    %11 = vector.broadcast %cst_7 : f32 to vector<8x128xf32>
    %12 = arith.mulf %10, %11 : vector<8x128xf32>
    %c0_8 = arith.constant 0 : index
    %c0_9 = arith.constant 0 : index
    %13 = vector.load %arg4[%c0_8, %c0_9] : memref<8x128xf32, #tpu.memory_space<vmem>>, vector<8x128xf32>
    tpu.vector_store %arg4[%c0_8, %c0_9], %12 {strides = array<i32>} : memref<8x128xf32, #tpu.memory_space<vmem>>, vector<8x128xf32>,
    return
  }
  func.func @transform_0(%arg0: i32) -> (i32, i32) {
    %c0_i32 = arith.constant 0 : i32
    %c0_i32_0 = arith.constant 0 : i32
    %c0_i32_1 = arith.constant 0 : i32
    return %c0_i32, %c0_i32_0 : i32, i32
  }
  func.func @transform_1(%arg0: i32) -> (i32, i32) {
    %c0_i32 = arith.constant 0 : i32
    %c0_i32_0 = arith.constant 0 : i32
    return %c0_i32, %arg0 : i32, i32
  }
  func.func @transform_2(%arg0: i32) -> (i32, i32) {
    %c0_i32 = arith.constant 0 : i32
    %c0_i32_0 = arith.constant 0 : i32
    %c0_i32_1 = arith.constant 0 : i32
    return %c0_i32, %c0_i32_0 : i32, i32
  }
  func.func @transform_3(%arg0: i32) -> (i32, i32) {
    %c0_i32 = arith.constant 0 : i32
    %c0_i32_0 = arith.constant 0 : i32
    return %c0_i32, %arg0 : i32, i32
  }
}

module attributes {stable_mosaic.version = 11 : i64} {
  func.func @_block_tail_kernel(%arg0: i32, %arg1: memref<8x288xf32, #tpu.memory_space<vmem>>, %arg2: memref<288x128xf32, #tpu.memory_space<vmem>>, %arg3: memref<8x1xf32, #tpu.memory_space<vmem>>, %arg4: memref<8x64xf32, #tpu.memory_space<vmem>>, %arg5: memref<64x128xf32, #tpu.memory_space<vmem>>, %arg6: memref<8x128xf32, #tpu.memory_space<vmem>>) attributes {dimension_semantics = [#tpu.dimension_semantics<parallel>], iteration_bounds = array<i64: 1>, scalar_prefetch = 0 : i64, scratch_operands = 0 : i64, tpu.core_type = #tpu.core_type<tc>, window_params = [{pipeline_mode = #tpu.pipeline_mode<synchronous>, transform_indices = @transform_0, window_bounds = array<i64: 8, 288>}, {transform_indices = @transform_1, window_bounds = array<i64: 288, 128>}, {pipeline_mode = #tpu.pipeline_mode<synchronous>, transform_indices = @transform_2, window_bounds = array<i64: 8, 1>}, {pipeline_mode = #tpu.pipeline_mode<synchronous>, transform_indices = @transform_3, window_bounds = array<i64: 8, 64>}, {transform_indices = @transform_4, window_bounds = array<i64: 64, 128>}, {transform_indices = @transform_5, window_bounds = array<i64: 8, 128>}]} {
    %c0 = arith.constant 0 : index
    %c0_0 = arith.constant 0 : index
    %0 = vector.load %arg1[%c0, %c0_0] : memref<8x288xf32, #tpu.memory_space<vmem>>, vector<8x288xf32>
    %c0_1 = arith.constant 0 : index
    %c0_2 = arith.constant 0 : index
    %1 = vector.load %arg2[%c0_1, %c0_2] : memref<288x128xf32, #tpu.memory_space<vmem>>, vector<288x128xf32>
    %cst = arith.constant dense<0.000000e+00> : vector<8x128xf32>
    %2 = tpu.matmul %0, %1, %cst {dimension_numbers = #tpu.dot_dimension_numbers<[1], [0], [0], [1], [0, 0, 1, 1], [], []>} : vector<8x288xf32>, vector<288x128xf32>, vector<8x128xf32> -> vector<8x128xf32>
    %c0_3 = arith.constant 0 : index
    %c0_4 = arith.constant 0 : index
    %3 = vector.load %arg3[%c0_3, %c0_4] : memref<8x1xf32, #tpu.memory_space<vmem>>, vector<8x1xf32>
    %4 = vector.broadcast %3 : vector<8x1xf32> to vector<8x128xf32>
    %5 = arith.addf %2, %4 : vector<8x128xf32>
    %cst_5 = arith.constant 0.000000e+00 : f32
    %6 = vector.broadcast %cst_5 : f32 to vector<8x128xf32>
    %7 = arith.cmpf oge, %5, %6 : vector<8x128xf32>
    %cst_6 = arith.constant 2.000000e-01 : f32
    %8 = vector.broadcast %cst_6 : f32 to vector<8x128xf32>
    %9 = arith.mulf %8, %5 : vector<8x128xf32>
    %10 = arith.select %7, %5, %9 : vector<8x128xi1>, vector<8x128xf32>
    %cst_7 = arith.constant 1.41421354 : f32
    %11 = vector.broadcast %cst_7 : f32 to vector<8x128xf32>
    %12 = arith.mulf %10, %11 : vector<8x128xf32>
    %c0_8 = arith.constant 0 : index
    %c0_9 = arith.constant 0 : index
    %13 = vector.load %arg4[%c0_8, %c0_9] : memref<8x64xf32, #tpu.memory_space<vmem>>, vector<8x64xf32>
    %c0_10 = arith.constant 0 : index
    %c0_11 = arith.constant 0 : index
    %14 = vector.load %arg5[%c0_10, %c0_11] : memref<64x128xf32, #tpu.memory_space<vmem>>, vector<64x128xf32>
    %cst_12 = arith.constant dense<0.000000e+00> : vector<8x128xf32>
    %15 = tpu.matmul %13, %14, %cst_12 {dimension_numbers = #tpu.dot_dimension_numbers<[1], [0], [0], [1], [0, 0, 1, 1], [], []>} : vector<8x64xf32>, vector<64x128xf32>, vector<8x128xf32> -> vector<8x128xf32>
    %16 = arith.addf %12, %15 : vector<8x128xf32>
    %cst_13 = arith.constant 0.707106769 : f32
    %17 = vector.broadcast %cst_13 : f32 to vector<8x128xf32>
    %18 = arith.mulf %16, %17 : vector<8x128xf32>
    %c0_14 = arith.constant 0 : index
    %c0_15 = arith.constant 0 : index
    %19 = vector.load %arg6[%c0_14, %c0_15] : memref<8x128xf32, #tpu.memory_space<vmem>>, vector<8x128xf32>
    tpu.vector_store %arg6[%c0_14, %c0_15], %18 {strides = array<i32>} : memref<8x128xf32, #tpu.memory_space<vmem>>, vector<8x128xf32>,
    return
  }
  func.func @transform_0(%arg0: i32) -> (i32, i32) {
    %c0_i32 = arith.constant 0 : i32
    %c0_i32_0 = arith.constant 0 : i32
    %c0_i32_1 = arith.constant 0 : i32
    return %c0_i32, %c0_i32_0 : i32, i32
  }
  func.func @transform_1(%arg0: i32) -> (i32, i32) {
    %c0_i32 = arith.constant 0 : i32
    %c0_i32_0 = arith.constant 0 : i32
    return %c0_i32, %arg0 : i32, i32
  }
  func.func @transform_2(%arg0: i32) -> (i32, i32) {
    %c0_i32 = arith.constant 0 : i32
    %c0_i32_0 = arith.constant 0 : i32
    %c0_i32_1 = arith.constant 0 : i32
    return %c0_i32, %c0_i32_0 : i32, i32
  }
  func.func @transform_3(%arg0: i32) -> (i32, i32) {
    %c0_i32 = arith.constant 0 : i32
    %c0_i32_0 = arith.constant 0 : i32
    %c0_i32_1 = arith.constant 0 : i32
    return %c0_i32, %c0_i32_0 : i32, i32
  }
  func.func @transform_4(%arg0: i32) -> (i32, i32) {
    %c0_i32 = arith.constant 0 : i32
    %c0_i32_0 = arith.constant 0 : i32
    return %c0_i32, %arg0 : i32, i32
  }
  func.func @transform_5(%arg0: i32) -> (i32, i32) {
    %c0_i32 = arith.constant 0 : i32
    %c0_i32_0 = arith.constant 0 : i32
    return %c0_i32, %arg0 : i32, i32
  }
}

module attributes {stable_mosaic.version = 11 : i64} {
  func.func @_conv_act_kernel(%arg0: i32, %arg1: memref<16x72xf32, #tpu.memory_space<vmem>>, %arg2: memref<72x128xf32, #tpu.memory_space<vmem>>, %arg3: memref<16x1xf32, #tpu.memory_space<vmem>>, %arg4: memref<16x128xf32, #tpu.memory_space<vmem>>) attributes {dimension_semantics = [#tpu.dimension_semantics<parallel>], iteration_bounds = array<i64: 1>, scalar_prefetch = 0 : i64, scratch_operands = 0 : i64, tpu.core_type = #tpu.core_type<tc>, window_params = [{pipeline_mode = #tpu.pipeline_mode<synchronous>, transform_indices = @transform_0, window_bounds = array<i64: 16, 72>}, {transform_indices = @transform_1, window_bounds = array<i64: 72, 128>}, {pipeline_mode = #tpu.pipeline_mode<synchronous>, transform_indices = @transform_2, window_bounds = array<i64: 16, 1>}, {transform_indices = @transform_3, window_bounds = array<i64: 16, 128>}]} {
    %c0 = arith.constant 0 : index
    %c0_0 = arith.constant 0 : index
    %0 = vector.load %arg1[%c0, %c0_0] : memref<16x72xf32, #tpu.memory_space<vmem>>, vector<16x72xf32>
    %c0_1 = arith.constant 0 : index
    %c0_2 = arith.constant 0 : index
    %1 = vector.load %arg2[%c0_1, %c0_2] : memref<72x128xf32, #tpu.memory_space<vmem>>, vector<72x128xf32>
    %cst = arith.constant dense<0.000000e+00> : vector<16x128xf32>
    %2 = tpu.matmul %0, %1, %cst {dimension_numbers = #tpu.dot_dimension_numbers<[1], [0], [0], [1], [0, 0, 1, 1], [], []>} : vector<16x72xf32>, vector<72x128xf32>, vector<16x128xf32> -> vector<16x128xf32>
    %c0_3 = arith.constant 0 : index
    %c0_4 = arith.constant 0 : index
    %3 = vector.load %arg3[%c0_3, %c0_4] : memref<16x1xf32, #tpu.memory_space<vmem>>, vector<16x1xf32>
    %4 = vector.broadcast %3 : vector<16x1xf32> to vector<16x128xf32>
    %5 = arith.addf %2, %4 : vector<16x128xf32>
    %cst_5 = arith.constant 0.000000e+00 : f32
    %6 = vector.broadcast %cst_5 : f32 to vector<16x128xf32>
    %7 = arith.cmpf oge, %5, %6 : vector<16x128xf32>
    %cst_6 = arith.constant 2.000000e-01 : f32
    %8 = vector.broadcast %cst_6 : f32 to vector<16x128xf32>
    %9 = arith.mulf %8, %5 : vector<16x128xf32>
    %10 = arith.select %7, %5, %9 : vector<16x128xi1>, vector<16x128xf32>
    %cst_7 = arith.constant 1.41421354 : f32
    %11 = vector.broadcast %cst_7 : f32 to vector<16x128xf32>
    %12 = arith.mulf %10, %11 : vector<16x128xf32>
    %c0_8 = arith.constant 0 : index
    %c0_9 = arith.constant 0 : index
    %13 = vector.load %arg4[%c0_8, %c0_9] : memref<16x128xf32, #tpu.memory_space<vmem>>, vector<16x128xf32>
    tpu.vector_store %arg4[%c0_8, %c0_9], %12 {strides = array<i32>} : memref<16x128xf32, #tpu.memory_space<vmem>>, vector<16x128xf32>,
    return
  }
  func.func @transform_0(%arg0: i32) -> (i32, i32) {
    %c0_i32 = arith.constant 0 : i32
    %c0_i32_0 = arith.constant 0 : i32
    %c0_i32_1 = arith.constant 0 : i32
    return %c0_i32, %c0_i32_0 : i32, i32
  }
  func.func @transform_1(%arg0: i32) -> (i32, i32) {
    %c0_i32 = arith.constant 0 : i32
    %c0_i32_0 = arith.constant 0 : i32
    return %c0_i32, %arg0 : i32, i32
  }
  func.func @transform_2(%arg0: i32) -> (i32, i32) {
    %c0_i32 = arith.constant 0 : i32
    %c0_i32_0 = arith.constant 0 : i32
    %c0_i32_1 = arith.constant 0 : i32
    return %c0_i32, %c0_i32_0 : i32, i32
  }
  func.func @transform_3(%arg0: i32) -> (i32, i32) {
    %c0_i32 = arith.constant 0 : i32
    %c0_i32_0 = arith.constant 0 : i32
    return %c0_i32, %arg0 : i32, i32
  }
}

module attributes {stable_mosaic.version = 11 : i64} {
  func.func @_block_tail_kernel(%arg0: i32, %arg1: memref<16x576xf32, #tpu.memory_space<vmem>>, %arg2: memref<576x128xf32, #tpu.memory_space<vmem>>, %arg3: memref<16x1xf32, #tpu.memory_space<vmem>>, %arg4: memref<16x128xf32, #tpu.memory_space<vmem>>, %arg5: memref<128x128xf32, #tpu.memory_space<vmem>>, %arg6: memref<16x16xf32, #tpu.memory_space<vmem>>, %arg7: memref<16x1xf32, #tpu.memory_space<vmem>>, %arg8: memref<8x16xf32, #tpu.memory_space<vmem>>, %arg9: memref<8x1xf32, #tpu.memory_space<vmem>>, %arg10: memref<16x128xf32, #tpu.memory_space<vmem>>, %arg11: memref<8x128xf32, #tpu.memory_space<vmem>>) attributes {dimension_semantics = [#tpu.dimension_semantics<parallel>], iteration_bounds = array<i64: 1>, scalar_prefetch = 0 : i64, scratch_operands = 0 : i64, tpu.core_type = #tpu.core_type<tc>, window_params = [{pipeline_mode = #tpu.pipeline_mode<synchronous>, transform_indices = @transform_0, window_bounds = array<i64: 16, 576>}, {transform_indices = @transform_1, window_bounds = array<i64: 576, 128>}, {pipeline_mode = #tpu.pipeline_mode<synchronous>, transform_indices = @transform_2, window_bounds = array<i64: 16, 1>}, {pipeline_mode = #tpu.pipeline_mode<synchronous>, transform_indices = @transform_3, window_bounds = array<i64: 16, 128>}, {transform_indices = @transform_4, window_bounds = array<i64: 128, 128>}, {pipeline_mode = #tpu.pipeline_mode<synchronous>, transform_indices = @transform_5, window_bounds = array<i64: 16, 16>}, {pipeline_mode = #tpu.pipeline_mode<synchronous>, transform_indices = @transform_6, window_bounds = array<i64: 16, 1>}, {pipeline_mode = #tpu.pipeline_mode<synchronous>, transform_indices = @transform_7, window_bounds = array<i64: 8, 16>}, {pipeline_mode = #tpu.pipeline_mode<synchronous>, transform_indices = @transform_8, window_bounds = array<i64: 8, 1>}, {transform_indices = @transform_9, window_bounds = array<i64: 16, 128>}, {transform_indices = @transform_10, window_bounds = array<i64: 8, 128>}]} {
    %c0 = arith.constant 0 : index
    %c0_0 = arith.constant 0 : index
    %0 = vector.load %arg1[%c0, %c0_0] : memref<16x576xf32, #tpu.memory_space<vmem>>, vector<16x576xf32>
    %c0_1 = arith.constant 0 : index
    %c0_2 = arith.constant 0 : index
    %1 = vector.load %arg2[%c0_1, %c0_2] : memref<576x128xf32, #tpu.memory_space<vmem>>, vector<576x128xf32>
    %cst = arith.constant dense<0.000000e+00> : vector<16x128xf32>
    %2 = tpu.matmul %0, %1, %cst {dimension_numbers = #tpu.dot_dimension_numbers<[1], [0], [0], [1], [0, 0, 1, 1], [], []>} : vector<16x576xf32>, vector<576x128xf32>, vector<16x128xf32> -> vector<16x128xf32>
    %c0_3 = arith.constant 0 : index
    %c0_4 = arith.constant 0 : index
    %3 = vector.load %arg3[%c0_3, %c0_4] : memref<16x1xf32, #tpu.memory_space<vmem>>, vector<16x1xf32>
    %4 = vector.broadcast %3 : vector<16x1xf32> to vector<16x128xf32>
    %5 = arith.addf %2, %4 : vector<16x128xf32>
    %cst_5 = arith.constant 0.000000e+00 : f32
    %6 = vector.broadcast %cst_5 : f32 to vector<16x128xf32>
    %7 = arith.cmpf oge, %5, %6 : vector<16x128xf32>
    %cst_6 = arith.constant 2.000000e-01 : f32
    %8 = vector.broadcast %cst_6 : f32 to vector<16x128xf32>
    %9 = arith.mulf %8, %5 : vector<16x128xf32>
    %10 = arith.select %7, %5, %9 : vector<16x128xi1>, vector<16x128xf32>
    %cst_7 = arith.constant 1.41421354 : f32
    %11 = vector.broadcast %cst_7 : f32 to vector<16x128xf32>
    %12 = arith.mulf %10, %11 : vector<16x128xf32>
    %c0_8 = arith.constant 0 : index
    %c0_9 = arith.constant 0 : index
    %13 = vector.load %arg4[%c0_8, %c0_9] : memref<16x128xf32, #tpu.memory_space<vmem>>, vector<16x128xf32>
    %c0_10 = arith.constant 0 : index
    %c0_11 = arith.constant 0 : index
    %14 = vector.load %arg5[%c0_10, %c0_11] : memref<128x128xf32, #tpu.memory_space<vmem>>, vector<128x128xf32>
    %cst_12 = arith.constant dense<0.000000e+00> : vector<16x128xf32>
    %15 = tpu.matmul %13, %14, %cst_12 {dimension_numbers = #tpu.dot_dimension_numbers<[1], [0], [0], [1], [0, 0, 1, 1], [], []>} : vector<16x128xf32>, vector<128x128xf32>, vector<16x128xf32> -> vector<16x128xf32>
    %16 = arith.addf %12, %15 : vector<16x128xf32>
    %cst_13 = arith.constant 0.707106769 : f32
    %17 = vector.broadcast %cst_13 : f32 to vector<16x128xf32>
    %18 = arith.mulf %16, %17 : vector<16x128xf32>
    %c0_14 = arith.constant 0 : index
    %c0_15 = arith.constant 0 : index
    %19 = vector.load %arg10[%c0_14, %c0_15] : memref<16x128xf32, #tpu.memory_space<vmem>>, vector<16x128xf32>
    tpu.vector_store %arg10[%c0_14, %c0_15], %18 {strides = array<i32>} : memref<16x128xf32, #tpu.memory_space<vmem>>, vector<16x128xf32>,
    %c0_16 = arith.constant 0 : index
    %c0_17 = arith.constant 0 : index
    %20 = vector.load %arg6[%c0_16, %c0_17] : memref<16x16xf32, #tpu.memory_space<vmem>>, vector<16x16xf32>
    %cst_18 = arith.constant dense<0.000000e+00> : vector<16x128xf32>
    %21 = tpu.matmul %20, %18, %cst_18 {dimension_numbers = #tpu.dot_dimension_numbers<[1], [0], [0], [1], [0, 0, 1, 1], [], []>} : vector<16x16xf32>, vector<16x128xf32>, vector<16x128xf32> -> vector<16x128xf32>
    %c0_19 = arith.constant 0 : index
    %c0_20 = arith.constant 0 : index
    %22 = vector.load %arg7[%c0_19, %c0_20] : memref<16x1xf32, #tpu.memory_space<vmem>>, vector<16x1xf32>
    %23 = vector.broadcast %22 : vector<16x1xf32> to vector<16x128xf32>
    %24 = arith.addf %21, %23 : vector<16x128xf32>
    %cst_21 = arith.constant 0.000000e+00 : f32
    %25 = vector.broadcast %cst_21 : f32 to vector<16x128xf32>
    %26 = arith.cmpf oge, %24, %25 : vector<16x128xf32>
    %cst_22 = arith.constant 2.000000e-01 : f32
    %27 = vector.broadcast %cst_22 : f32 to vector<16x128xf32>
    %28 = arith.mulf %27, %24 : vector<16x128xf32>
    %29 = arith.select %26, %24, %28 : vector<16x128xi1>, vector<16x128xf32>
    %cst_23 = arith.constant 1.41421354 : f32
    %30 = vector.broadcast %cst_23 : f32 to vector<16x128xf32>
    %31 = arith.mulf %29, %30 : vector<16x128xf32>
    %c0_24 = arith.constant 0 : index
    %c0_25 = arith.constant 0 : index
    %32 = vector.load %arg8[%c0_24, %c0_25] : memref<8x16xf32, #tpu.memory_space<vmem>>, vector<8x16xf32>
    %cst_26 = arith.constant dense<0.000000e+00> : vector<8x128xf32>
    %33 = tpu.matmul %32, %31, %cst_26 {dimension_numbers = #tpu.dot_dimension_numbers<[1], [0], [0], [1], [0, 0, 1, 1], [], []>} : vector<8x16xf32>, vector<16x128xf32>, vector<8x128xf32> -> vector<8x128xf32>
    %c0_27 = arith.constant 0 : index
    %c0_28 = arith.constant 0 : index
    %34 = vector.load %arg9[%c0_27, %c0_28] : memref<8x1xf32, #tpu.memory_space<vmem>>, vector<8x1xf32>
    %35 = vector.broadcast %34 : vector<8x1xf32> to vector<8x128xf32>
    %36 = arith.addf %33, %35 : vector<8x128xf32>
    %cst_29 = arith.constant 0.000000e+00 : f32
    %37 = vector.broadcast %cst_29 : f32 to vector<8x128xf32>
    %38 = arith.cmpf oge, %36, %37 : vector<8x128xf32>
    %cst_30 = arith.constant 2.000000e-01 : f32
    %39 = vector.broadcast %cst_30 : f32 to vector<8x128xf32>
    %40 = arith.mulf %39, %36 : vector<8x128xf32>
    %41 = arith.select %38, %36, %40 : vector<8x128xi1>, vector<8x128xf32>
    %cst_31 = arith.constant 1.41421354 : f32
    %42 = vector.broadcast %cst_31 : f32 to vector<8x128xf32>
    %43 = arith.mulf %41, %42 : vector<8x128xf32>
    %c0_32 = arith.constant 0 : index
    %c0_33 = arith.constant 0 : index
    %44 = vector.load %arg11[%c0_32, %c0_33] : memref<8x128xf32, #tpu.memory_space<vmem>>, vector<8x128xf32>
    tpu.vector_store %arg11[%c0_32, %c0_33], %43 {strides = array<i32>} : memref<8x128xf32, #tpu.memory_space<vmem>>, vector<8x128xf32>,
    return
  }
  func.func @transform_0(%arg0: i32) -> (i32, i32) {
    %c0_i32 = arith.constant 0 : i32
    %c0_i32_0 = arith.constant 0 : i32
    %c0_i32_1 = arith.constant 0 : i32
    return %c0_i32, %c0_i32_0 : i32, i32
  }
  func.func @transform_1(%arg0: i32) -> (i32, i32) {
    %c0_i32 = arith.constant 0 : i32
    %c0_i32_0 = arith.constant 0 : i32
    return %c0_i32, %arg0 : i32, i32
  }
  func.func @transform_2(%arg0: i32) -> (i32, i32) {
    %c0_i32 = arith.constant 0 : i32
    %c0_i32_0 = arith.constant 0 : i32
    %c0_i32_1 = arith.constant 0 : i32
    return %c0_i32, %c0_i32_0 : i32, i32
  }
  func.func @transform_3(%arg0: i32) -> (i32, i32) {
    %c0_i32 = arith.constant 0 : i32
    %c0_i32_0 = arith.constant 0 : i32
    %c0_i32_1 = arith.constant 0 : i32
    return %c0_i32, %c0_i32_0 : i32, i32
  }
  func.func @transform_4(%arg0: i32) -> (i32, i32) {
    %c0_i32 = arith.constant 0 : i32
    %c0_i32_0 = arith.constant 0 : i32
    return %c0_i32, %arg0 : i32, i32
  }
  func.func @transform_5(%arg0: i32) -> (i32, i32) {
    %c0_i32 = arith.constant 0 : i32
    %c0_i32_0 = arith.constant 0 : i32
    %c0_i32_1 = arith.constant 0 : i32
    return %c0_i32, %c0_i32_0 : i32, i32
  }
  func.func @transform_6(%arg0: i32) -> (i32, i32) {
    %c0_i32 = arith.constant 0 : i32
    %c0_i32_0 = arith.constant 0 : i32
    %c0_i32_1 = arith.constant 0 : i32
    return %c0_i32, %c0_i32_0 : i32, i32
  }
  func.func @transform_7(%arg0: i32) -> (i32, i32) {
    %c0_i32 = arith.constant 0 : i32
    %c0_i32_0 = arith.constant 0 : i32
    %c0_i32_1 = arith.constant 0 : i32
    return %c0_i32, %c0_i32_0 : i32, i32
  }
  func.func @transform_8(%arg0: i32) -> (i32, i32) {
    %c0_i32 = arith.constant 0 : i32
    %c0_i32_0 = arith.constant 0 : i32
    %c0_i32_1 = arith.constant 0 : i32
    return %c0_i32, %c0_i32_0 : i32, i32
  }
  func.func @transform_9(%arg0: i32) -> (i32, i32) {
    %c0_i32 = arith.constant 0 : i32
    %c0_i32_0 = arith.constant 0 : i32
    return %c0_i32, %arg0 : i32, i32
  }
  func.func @transform_10(%arg0: i32) -> (i32, i32) {
    %c0_i32 = arith.constant 0 : i32
    %c0_i32_0 = arith.constant 0 : i32
    return %c0_i32, %arg0 : i32, i32
  }
}

</mosaic_0001>

<bundles_post_ra>
// kernel: cifar_str_branch_forward.6
= control target key start
LH: loop header
LB: loop body
LE: loop exit
PB: predicated region body
PF: predicated region fallthrough
CT: control target
= control target key end

     0   :  { %s444_s12 = smov 0   ;;  %s446_s13 = smov 0   ;;  %s505_s0 = inlined_call_operand.vmem [shape: f32[4,36], index: 0, kind: input, shape index: {}]   ;;  %s506_s1 = inlined_call_operand.vmem [shape: f32[36,512], index: 1, kind: input, shape index: {}]   ;;  %s507_s2 = inlined_call_operand.vmem [shape: f32[4,1], index: 2, kind: input, shape index: {}]   ;;  %s508_s3 = inlined_call_operand.vmem [shape: f32[4,512], index: 3, kind: output, shape index: {}]  }
   0x1   :  { %s448_s14 = smov 0  }
   0x2 LB: > { %s355_s15 = sadd.s32 4294967295, %s421_s14   ;;  %s461_s16 = sadd.s32 1, %s421_s14   ;;  %s421_s14 = sphi %s448_s14, %s511_s14   ;;  %s417_s13 = sphi %s446_s13, %s510_s13   ;;  %s413_s12 = sphi %s444_s12, %s509_s12  }
   0x3   : > { %s38_s17 = ssub.s32 %s421_s14, %s461_s16  ;;  %s41_s18 = sadd.s32 1, %s417_s13 }
   0x4   : > { %p39_p0 = scmp.eq.s32.totalorder %s38_s17, 0  ;;  %p48_p1 = scmp.ne.s32.totalorder %s417_s13, %s413_s12 }
   0x5   : > { %p49_p2 = scmp.eq.s32.totalorder %s421_s14, 0  ;;  %p358_p4 = scmp.ge.s32.totalorder %s421_s14, 2 }
   0x6   : > { %s470_s19 = scalar_select %p39_p0, %s417_s13, %s41_s18  }
   0x7   : > { %p50_p3 = por %p49_p2, %p48_p1  ;;  %127 = sbr.rel (%p358_p4) target bundleno = 26 (0x1a), region = 24 }
   0xc   : > { %130 = sbr.rel (!%p50_p3) target bundleno = 26 (0x1a), region = 28  ;;  %s132_s20 = sand.u32 (%p50_p3), 1, %s417_s13  }
   0xd   : > { %s370_s21 = sshll.u32 (%p50_p3), %s421_s14, 4  ;;  %s371_s22 = smul.u32 (%p50_p3), 80, %s132_s20 }
   0xe   : > { %s137_s25 = scalar_lea.vmem (%p50_p3), %s506_s1, %s370_s21 }
   0xf   : > { %v150_v0 = vld [vmem:[%s137_s25] sm:$0xff] (%p50_p3)  ;;  %v152_v1 = vld [vmem:[%s137_s25 + $0x8] sm:$0xff] (%p50_p3)  ;;  %s134_s26 = scalar_lea.vmem (%p50_p3), [#allocation2], %s371_s22 }
  0x10   : > { %v154_v2 = vld [vmem:[%s137_s25 + $0x20] sm:$0xff] (%p50_p3)  ;;  %151 = vst [vmem:[%s134_s26] sm:$0xff] (%p50_p3), %v150_v0  ;;  %v156_v3 = vld [vmem:[%s137_s25 + $0x28] sm:$0xff] (%p50_p3) }
  0x11   : > { %153 = vst [vmem:[%s134_s26 + $0x8] sm:$0xff] %v152_v1  ;;  %v158_v4 = vld [vmem:[%s137_s25 + $0x40] sm:$0xff]  ;;  %v160_v5 = vld [vmem:[%s137_s25 + $0x48] sm:$0xff] }
  0x12   : > { %155 = vst [vmem:[%s134_s26 + $0x10] sm:$0xff] %v154_v2  ;;  %v162_v6 = vld [vmem:[%s137_s25 + $0x60] sm:$0xff]  ;;  %v164_v7 = vld [vmem:[%s137_s25 + $0x68] sm:$0xff] }
  0x13   : > { %157 = vst [vmem:[%s134_s26 + $0x18] sm:$0xff] %v156_v3  ;;  %v166_v8 = vld [vmem:[%s137_s25 + $0x80] sm:$0xff]  ;;  %v168_v9 = vld [vmem:[%s137_s25 + $0x88] sm:$0xff] }
  0x14   : > { %159 = vst [vmem:[%s134_s26 + $0x20] sm:$0xff] %v158_v4 }
  0x15   : > { %161 = vst [vmem:[%s134_s26 + $0x28] sm:$0xff] %v160_v5 }
  0x16   : > { %163 = vst [vmem:[%s134_s26 + $0x30] sm:$0xff] %v162_v6 }
  0x17   : > { %165 = vst [vmem:[%s134_s26 + $0x38] sm:$0xff] %v164_v7 }
  0x18   : > { %167 = vst [vmem:[%s134_s26 + $0x40] sm:$0xff] %v166_v8 }
  0x19   : > { %169 = vst [vmem:[%s134_s26 + $0x48] sm:$0xff] %v168_v9 }
  0x1a PF: > { %p361_p5 = scmp.ge.s32.totalorder %s421_s14, 1  ;;  %p174_p6 = scmp.lt.s32.totalorder %s421_s14, 3 }
  0x1c   : > { %p175_p7 = pnand %p361_p5, %p174_p6 }
  0x1d   : > { %s181_s27 = sand.u32 (!%p175_p7), 1, %s413_s12   ;;  %s362_s7 = sshll.u32 (!%p175_p7), %s355_s15, 1 }
  0x1e   : > { %178 = sbr.rel (%p175_p7) target bundleno = 182 (0xb6), region = 51  ;;  %p206_p8 = scmp.lt.s32.totalorder (!%p175_p7), %s362_s7, 3 }
  0x1f   : > { %s372_s28 = smul.u32 (!%p175_p7), 80, %s181_s27 }
  0x21   : > { %s183_s4 = scalar_lea.vmem (!%p175_p7), [#allocation2], %s372_s28 }
  0x23   : > { %v423_v10 = vmov 0   ;;  %v222_v11 = vld [vmem:[%s507_s2] sm:$0xf]  ;;  %vm232_vm0 = vcmask 1043456   ;;  %v221_v13 = vld [vmem:[%s183_s4 + $0x48] sm:$0xf] }
  0x24   : > { %398 = vset.pattern.permute.xlu0 %v423_v10  ;;  %v220_v12 = vld [vmem:[%s183_s4 + $0x40] sm:$0xf]  ;;  %v218_v14 = vld [vmem:[%s183_s4 + $0x30] sm:$0xff]  ;;  %366 = vmatpush.msk.msra.mxu1 %vm232_vm0, %v221_v13  ;;  %v219_v15 = vld [vmem:[%s183_s4 + $0x38] sm:$0xff]  ;;  %vm228_vm1 = vcmask 293888   ;;  %s513_s7 = smov (!%p206_p8, %s362_s7), 3 }
  0x25   : > { %225 = vperm.xlu0 %398, %v222_v11   ;;  %364 = vmatpush.msk.msra.mxu0 %vm232_vm0, %v220_v12  ;;  %v216_v16 = vld [vmem:[%s183_s4 + $0x20] sm:$0xff]  ;;  %v217_v17 = vld [vmem:[%s183_s4 + $0x28] sm:$0xff]  ;;  %v214_v18 = vld [vmem:[%s183_s4 + $0x10] sm:$0xff]  ;;  %s363_s8 = sshll.u32 %s513_s7, 2 }
  0x26   : > { %271 = vmatpush.msra.mxu1 %v219_v15  ;;  %v215_v19 = vld [vmem:[%s183_s4 + $0x18] sm:$0xff]  ;;  %v212_v20 = vld [vmem:[%s183_s4] sm:$0xff]  ;;  %v213_v21 = vld [vmem:[%s183_s4 + $0x8] sm:$0xff]  ;;  %s209_s11 = scalar_lea.vmem %s508_s3, %s363_s8 }
  0x27   : > { %251 = vmatpush.msra.mxu0 %v218_v14  ;;  %v211_v22 = vld [vmem:[%s505_s0] sm:$0xf] }
  0x28   : > { %272 = vmatpush.msra.mxu1 %v217_v17 }
  0x29   : > { %252 = vmatpush.msra.mxu0 %v216_v16 }
  0x2a   : > { %273 = vmatpush.msra.mxu1 %v215_v19 }
  0x2b   : > { %253 = vmatpush.msra.mxu0 %v214_v18 }
  0x2c   : > { %274 = vmatpush.msra.mxu1 %v213_v21 }
  0x2d   : > { %254 = vmatpush.msra.mxu0 %v212_v20  ;;  %367 = vmatmul.msk.f32.vlgmr.msra.gmra.mxu1 %vm228_vm1, %v211_v22 }
  0x2e   : > { %365 = vmatmul.msk.f32.vlgmr.msra.gmra.mxu0 %vm228_vm1, %v211_v22 }
  0x97   : > { %v226_v23 = vpop.permute.xlu0 %225 }
  0xaa   : > { %v276_v25 = vpop.f32.mrf.mxu1 }
  0xab   : > { %v256_v24 = vpop.f32.mrf.mxu0  ;;  %v277_v27 = vadd.f32 %v276_v25, %v226_v23 }
  0xac   : > { %v257_v26 = vadd.f32 %v256_v24, %v226_v23 }
  0xad   : > { %vm280_vm3 = vcmp.ge.f32.partialorder %v277_v27, 0.0  ;;  %v282_v29 = vmul.f32 0.2, %v277_v27 }
  0xae   : > { %vm279_vm2 = vcmp.ge.f32.partialorder %v257_v26, 0.0  ;;  %v281_v28 = vmul.f32 0.2, %v257_v26 }
  0xaf   : > { %v284_v31 = vsel %vm280_vm3, %v277_v27, %v282_v29 }
  0xb0   : > { %v283_v30 = vsel %vm279_vm2, %v257_v26, %v281_v28  ;;  %v286_v32 = vmul.f32 1.4142135, %v284_v31 }
  0xb1   : > { %v285_v33 = vmul.f32 1.4142135, %v283_v30 }
  0xb2   : > { %v289_v34 = vrot.slane %v286_v32, 4 }
  0xb4   : > { %v290_v35 = vsel %vm232_vm0, %v285_v33, %v289_v34 }
  0xb5   : > { %292 = vst [vmem:[%s209_s11] sm:$0xff] %v290_v35 }
  0xb6 PF: > { %p10_p9 = scmp.ge.s32.totalorder %s461_s16, 4   ;;  %s509_s12 = smov %s417_s13 }
  0xb7   : > { %s510_s13 = smov %s470_s19  ;;  %s511_s14 = smov %s461_s16 }
  0xb8   :  { %12 = sbr.rel (!%p10_p9) target bundleno = 2 (0x2), region = 90 }

// kernel: cifar_str_branch_forward.7
= control target key start
LH: loop header
LB: loop body
LE: loop exit
PB: predicated region body
PF: predicated region fallthrough
CT: control target
= control target key end

     0   :  { %v141_v2 = vmov 0   ;;  %vm50_vm0 = vcmask 130048   ;;  %vm106_vm1 = vcmask 523264   ;;  %s262_s1 = inlined_call_operand.vmem [shape: f32[144,128], index: 1, kind: input, shape index: {}]   ;;  %s263_s4 = inlined_call_operand.vmem [shape: f32[64,128], index: 4, kind: input, shape index: {}]   ;;  %s264_s0 = inlined_call_operand.vmem [shape: f32[4,144], index: 0, kind: input, shape index: {}]   ;;  %s265_s2 = inlined_call_operand.vmem [shape: f32[4,1], index: 2, kind: input, shape index: {}]   ;;  %s266_s3 = inlined_call_operand.vmem [shape: f32[4,64], index: 3, kind: input, shape index: {}]   ;;  %s267_s5 = inlined_call_operand.vmem [shape: f32[4,128], index: 5, kind: output, shape index: {}]  }
   0x1   :  { %v36_v0 = vld [vmem:[%s262_s1 + $0x78] sm:$0xff]  ;;  %v35_v1 = vld [vmem:[%s262_s1 + $0x70] sm:$0xff]  ;;  %140 = vset.pattern.permute.xlu0 %v141_v2  ;;  %v34_v3 = vld [vmem:[%s262_s1 + $0x68] sm:$0xff] }
   0x2   :  { %53 = vmatpush.msra.mxu0 %v36_v0  ;;  %v105_v4 = vld [vmem:[%s263_s4 + $0x38] sm:$0xff]  ;;  %v33_v5 = vld [vmem:[%s262_s1 + $0x60] sm:$0xff]  ;;  %v104_v6 = vld [vmem:[%s263_s4 + $0x30] sm:$0xff] }
   0x3   :  { %118 = vmatpush.msra.mxu2 %v105_v4  ;;  %v103_v7 = vld [vmem:[%s263_s4 + $0x28] sm:$0xff]  ;;  %v32_v8 = vld [vmem:[%s262_s1 + $0x58] sm:$0xff]  ;;  %v102_v9 = vld [vmem:[%s263_s4 + $0x20] sm:$0xff] }
   0x4   :  { %54 = vmatpush.msra.mxu0 %v35_v1  ;;  %v38_v10 = vld [vmem:[%s262_s1 + $0x88] sm:$0xff]  ;;  %v20_v11 = vld [vmem:[%s264_s0] sm:$0xff]  ;;  %v31_v12 = vld [vmem:[%s262_s1 + $0x50] sm:$0xff] }
   0x5   :  { %119 = vmatpush.msra.mxu2 %v104_v6  ;;  %87 = vmatpush.msra.mxu1 %v38_v10  ;;  %46 = vst [vmem:[#allocation1] ss:$2 sm:$0xff] %v20_v11  ;;  %v37_v13 = vld [vmem:[%s262_s1 + $0x80] sm:$0xff]  ;;  %v101_v14 = vld [vmem:[%s263_s4 + $0x18] sm:$0xff]  ;;  %v30_v16 = vld [vmem:[%s262_s1 + $0x48] sm:$0xff] }
   0x6   :  { %55 = vmatpush.msra.mxu0 %v34_v3  ;;  %v39_v15 = vld [vmem:[%s265_s2] sm:$0xf]  ;;  %v100_v17 = vld [vmem:[%s263_s4 + $0x10] sm:$0xff]  ;;  %v99_v19 = vld [vmem:[%s263_s4 + $0x8] sm:$0xff] }
   0x7   :  { %120 = vmatpush.msra.mxu2 %v103_v7  ;;  %88 = vmatpush.msra.mxu1 %v37_v13  ;;  %v29_v18 = vld [vmem:[%s262_s1 + $0x40] sm:$0xff]  ;;  %v28_v20 = vld [vmem:[%s262_s1 + $0x38] sm:$0xff]  ;;  %v27_v23 = vld [vmem:[%s262_s1 + $0x30] sm:$0xff] }
   0x8   :  { %56 = vmatpush.msra.mxu0 %v33_v5  ;;  %42 = vperm.xlu0 %140, %v39_v15   ;;  %v98_v22 = vld [vmem:[%s263_s4] sm:$0xff]  ;;  %v26_v25 = vld [vmem:[%s262_s1 + $0x28] sm:$0xff]  ;;  %v24_v27 = vld [vmem:[%s262_s1 + $0x18] sm:$0xff] }
   0x9   :  { %121 = vmatpush.msra.mxu2 %v102_v9  ;;  %v97_v24 = vld [vmem:[%s266_s3] sm:$0xf]  ;;  %v23_v28 = vld [vmem:[%s262_s1 + $0x10] sm:$0xff]  ;;  %v22_v29 = vld [vmem:[%s262_s1 + $0x8] sm:$0xff] }
   0xa   :  { %57 = vmatpush.msra.mxu0 %v32_v8  ;;  %v25_v26 = vld [vmem:[%s262_s1 + $0x20] sm:$0xff] }
   0xb   :  { %122 = vmatpush.msra.mxu2 %v101_v14  ;;  %v21_v30 = vld [vmem:[%s262_s1] sm:$0xff] }
   0xc   :  { %58 = vmatpush.msra.mxu0 %v31_v12  ;;  %v48_v21 = vld.sshfl [vmem:[#allocation1 + $0x8] sm:$0xff pattern:$0x75316420]  ;;  %v47_v31 = vld.sshfl [vmem:[#allocation1] sm:$0xff pattern:$0x75316420] }
   0xd   :  { %123 = vmatpush.msra.mxu2 %v100_v17  ;;  %137 = vmatmul.msk.f32.vlgmr.msra.gmra.mxu1 %vm50_vm0, %v48_v21 }
   0xe   :  { %59 = vmatpush.msra.mxu0 %v30_v16 }
   0xf   :  { %124 = vmatpush.msra.mxu2 %v99_v19 }
  0x10   :  { %60 = vmatpush.msra.mxu0 %v29_v18 }
  0x11   :  { %125 = vmatpush.msra.mxu2 %v98_v22 }
  0x12   :  { %61 = vmatpush.msra.mxu0 %v28_v20  ;;  %138 = vmatmul.msk.f32.vlgmr.msra.gmra.mxu2 %vm106_vm1, %v97_v24 }
  0x14   :  { %62 = vmatpush.msra.mxu0 %v27_v23 }
  0x16   :  { %63 = vmatpush.msra.mxu0 %v26_v25 }
  0x18   :  { %64 = vmatpush.msra.mxu0 %v25_v26 }
  0x1a   :  { %65 = vmatpush.msra.mxu0 %v24_v27 }
  0x1c   :  { %66 = vmatpush.msra.mxu0 %v23_v28 }
  0x1e   :  { %67 = vmatpush.msra.mxu0 %v22_v29 }
  0x20   :  { %68 = vmatpush.msra.mxu0 %v21_v30 }
  0x21   :  { %69 = vmatmul.f32.vlgmr.msra.gmra.mxu0 %v47_v31 }
  0x7a   :  { %v43_v32 = vpop.permute.xlu0 %42 }
  0x8a   :  { %v90_v34 = vpop.f32.mrf.mxu1 }
  0x95   :  { %v127_v39 = vpop.f32.mrf.mxu2 }
  0x9e   :  { %v70_v33 = vpop.f32.mrf.mxu0 }
  0x9f   :  { %v71_v35 = vadd.f32 %v70_v33, %v43_v32 }
  0xa1   :  { %v91_v36 = vadd.f32 %v90_v34, %v71_v35 }
  0xa3   :  { %v94_v37 = vmul.f32 0.2, %v91_v36  ;;  %vm93_vm2 = vcmp.ge.f32.partialorder %v91_v36, 0.0 }
  0xa5   :  { %v95_v38 = vsel %vm93_vm2, %v91_v36, %v94_v37 }
  0xa6   :  { %v96_v40 = vmul.f32 1.4142135, %v95_v38 }
  0xa8   :  { %v130_v41 = vadd.f32 %v127_v39, %v96_v40 }
  0xaa   :  { %v131_v42 = vmul.f32 0.70710677, %v130_v41 }
  0xac   :  { %132 = vst [vmem:[%s267_s5] sm:$0xf] %v131_v42 }

// kernel: cifar_str_branch_forward.8
= control target key start
LH: loop header
LB: loop body
LE: loop exit
PB: predicated region body
PF: predicated region fallthrough
CT: control target
= control target key end

     0   :  { %vm30_vm0 = vcmask 1043456   ;;  %v67_v2 = vmov 0   ;;  %vm26_vm1 = vcmask 293888   ;;  %s112_s1 = inlined_call_operand.vmem [shape: f32[36,128], index: 1, kind: input, shape index: {}]   ;;  %s113_s2 = inlined_call_operand.vmem [shape: f32[8,1], index: 2, kind: input, shape index: {}]   ;;  %s114_s0 = inlined_call_operand.vmem [shape: f32[8,36], index: 0, kind: input, shape index: {}]   ;;  %s115_s3 = inlined_call_operand.vmem [shape: f32[8,128], index: 3, kind: output, shape index: {}]  }
   0x1   :  { %v19_v0 = vld [vmem:[%s112_s1 + $0x20] sm:$0xf]  ;;  %v18_v1 = vld [vmem:[%s112_s1 + $0x18] sm:$0xff]  ;;  %66 = vset.pattern.permute.xlu0 %v67_v2  ;;  %v17_v3 = vld [vmem:[%s112_s1 + $0x10] sm:$0xff] }
   0x2   :  { %63 = vmatpush.msk.msra.mxu0 %vm30_vm0, %v19_v0  ;;  %v20_v4 = vld [vmem:[%s113_s2] sm:$0xff]  ;;  %v16_v5 = vld [vmem:[%s112_s1 + $0x8] sm:$0xff] }
   0x3   :  { %23 = vperm.xlu0 %66, %v20_v4   ;;  %v15_v6 = vld [vmem:[%s112_s1] sm:$0xff] }
   0x4   :  { %46 = vmatpush.msra.mxu0 %v18_v1  ;;  %v14_v7 = vld [vmem:[%s114_s0] sm:$0xff] }
   0x6   :  { %47 = vmatpush.msra.mxu0 %v17_v3 }
   0x8   :  { %48 = vmatpush.msra.mxu0 %v16_v5 }
   0xa   :  { %49 = vmatpush.msra.mxu0 %v15_v6 }
   0xb   :  { %64 = vmatmul.msk.f32.vlgmr.msra.gmra.mxu0 %vm26_vm1, %v14_v7 }
  0x75   :  { %v24_v8 = vpop.permute.xlu0 %23 }
  0x88   :  { %v51_v9 = vpop.f32.mrf.mxu0 }
  0x89   :  { %v52_v10 = vadd.f32 %v51_v9, %v24_v8 }
  0x8b   :  { %vm54_vm2 = vcmp.ge.f32.partialorder %v52_v10, 0.0  ;;  %v55_v11 = vmul.f32 0.2, %v52_v10 }
  0x8d   :  { %v56_v12 = vsel %vm54_vm2, %v52_v10, %v55_v11 }
  0x8e   :  { %v57_v13 = vmul.f32 1.4142135, %v56_v12 }
  0x90   :  { %58 = vst [vmem:[%s115_s3] sm:$0xff] %v57_v13 }

// kernel: cifar_str_branch_forward.9
= control target key start
LH: loop header
LB: loop body
LE: loop exit
PB: predicated region body
PF: predicated region fallthrough
CT: control target
= control target key end

     0   :  { %v177_v6 = vmov 0   ;;  %vm65_vm0 = vcmask 261120   ;;  %vm142_vm1 = vcmask 523264   ;;  %s358_s1 = inlined_call_operand.vmem [shape: f32[288,128], index: 1, kind: input, shape index: {}]   ;;  %s359_s4 = inlined_call_operand.vmem [shape: f32[64,128], index: 4, kind: input, shape index: {}]   ;;  %s360_s0 = inlined_call_operand.vmem [shape: f32[8,288], index: 0, kind: input, shape index: {}]   ;;  %s361_s2 = inlined_call_operand.vmem [shape: f32[8,1], index: 2, kind: input, shape index: {}]   ;;  %s362_s3 = inlined_call_operand.vmem [shape: f32[8,64], index: 3, kind: input, shape index: {}]   ;;  %s363_s5 = inlined_call_operand.vmem [shape: f32[8,128], index: 5, kind: output, shape index: {}]  }
   0x1   :  { %v38_v0 = vld [vmem:[%s358_s1 + $0x78] sm:$0xff]  ;;  %v37_v1 = vld [vmem:[%s358_s1 + $0x70] sm:$0xff]  ;;  %v36_v4 = vld [vmem:[%s358_s1 + $0x68] sm:$0xff]  ;;  %176 = vset.pattern.permute.xlu0 %v177_v6 }
   0x2   :  { %v54_v2 = vld [vmem:[%s358_s1 + $0xf8] sm:$0xff]  ;;  %69 = vmatpush.msra.mxu0 %v38_v0  ;;  %v53_v3 = vld [vmem:[%s358_s1 + $0xf0] sm:$0xff]  ;;  %v52_v5 = vld [vmem:[%s358_s1 + $0xe8] sm:$0xff] }
   0x3   :  { %89 = vmatpush.msra.mxu1 %v54_v2  ;;  %v35_v7 = vld [vmem:[%s358_s1 + $0x60] sm:$0xff]  ;;  %v34_v9 = vld [vmem:[%s358_s1 + $0x58] sm:$0xff]  ;;  %v33_v11 = vld [vmem:[%s358_s1 + $0x50] sm:$0xff] }
   0x4   :  { %70 = vmatpush.msra.mxu0 %v37_v1  ;;  %v51_v8 = vld [vmem:[%s358_s1 + $0xe0] sm:$0xff]  ;;  %v50_v10 = vld [vmem:[%s358_s1 + $0xd8] sm:$0xff]  ;;  %v49_v13 = vld [vmem:[%s358_s1 + $0xd0] sm:$0xff] }
   0x5   :  { %90 = vmatpush.msra.mxu1 %v53_v3  ;;  %v141_v12 = vld [vmem:[%s359_s4 + $0x38] sm:$0xff]  ;;  %v140_v15 = vld [vmem:[%s359_s4 + $0x30] sm:$0xff]  ;;  %v139_v17 = vld [vmem:[%s359_s4 + $0x28] sm:$0xff] }
   0x6   :  { %71 = vmatpush.msra.mxu0 %v36_v4  ;;  %154 = vmatpush.msra.mxu3 %v141_v12  ;;  %v58_v14 = vld [vmem:[%s358_s1 + $0x118] sm:$0xff]  ;;  %v57_v16 = vld [vmem:[%s358_s1 + $0x110] sm:$0xff]  ;;  %v32_v18 = vld [vmem:[%s358_s1 + $0x48] sm:$0xff] }
   0x7   :  { %91 = vmatpush.msra.mxu1 %v52_v5  ;;  %v48_v19 = vld [vmem:[%s358_s1 + $0xc8] sm:$0xff]  ;;  %121 = vmatpush.msra.mxu2 %v58_v14  ;;  %v138_v21 = vld [vmem:[%s359_s4 + $0x20] sm:$0xff]  ;;  %v137_v25 = vld [vmem:[%s359_s4 + $0x18] sm:$0xff] }
   0x8   :  { %72 = vmatpush.msra.mxu0 %v35_v7  ;;  %155 = vmatpush.msra.mxu3 %v140_v15  ;;  %v56_v20 = vld [vmem:[%s358_s1 + $0x108] sm:$0xff]  ;;  %v31_v22 = vld [vmem:[%s358_s1 + $0x40] sm:$0xff]  ;;  %v30_v26 = vld [vmem:[%s358_s1 + $0x38] sm:$0xff] }
   0x9   :  { %92 = vmatpush.msra.mxu1 %v51_v8  ;;  %v47_v23 = vld [vmem:[%s358_s1 + $0xc0] sm:$0xff]  ;;  %122 = vmatpush.msra.mxu2 %v57_v16  ;;  %v46_v27 = vld [vmem:[%s358_s1 + $0xb8] sm:$0xff]  ;;  %v22_v28 = vld [vmem:[%s360_s0 + $0x10] sm:$0xff] }
   0xa   :  { %73 = vmatpush.msra.mxu0 %v34_v9  ;;  %156 = vmatpush.msra.mxu3 %v139_v17  ;;  %v55_v24 = vld [vmem:[%s358_s1 + $0x100] sm:$0xff]  ;;  %v136_v29 = vld [vmem:[%s359_s4 + $0x10] sm:$0xff]  ;;  %v135_v32 = vld [vmem:[%s359_s4 + $0x8] sm:$0xff] }
   0xb   :  { %93 = vmatpush.msra.mxu1 %v50_v10  ;;  %123 = vmatpush.msra.mxu2 %v56_v20  ;;  %v29_v30 = vld [vmem:[%s358_s1 + $0x30] sm:$0xff]  ;;  %v59_v33 = vld [vmem:[%s361_s2] sm:$0xff]  ;;  %v28_v34 = vld [vmem:[%s358_s1 + $0x28] sm:$0xff] }
   0xc   :  { %74 = vmatpush.msra.mxu0 %v33_v11  ;;  %157 = vmatpush.msra.mxu3 %v138_v21  ;;  %v45_v31 = vld [vmem:[%s358_s1 + $0xb0] sm:$0xff]  ;;  %v44_v35 = vld [vmem:[%s358_s1 + $0xa8] sm:$0xff]  ;;  %v134_v36 = vld [vmem:[%s359_s4] sm:$0xff] }
   0xd   :  { %94 = vmatpush.msra.mxu1 %v49_v13  ;;  %124 = vmatpush.msra.mxu2 %v55_v24  ;;  %v27_v37 = vld [vmem:[%s358_s1 + $0x20] sm:$0xff]  ;;  %v26_v40 = vld [vmem:[%s358_s1 + $0x18] sm:$0xff]  ;;  %v25_v42 = vld [vmem:[%s358_s1 + $0x10] sm:$0xff] }
   0xe   :  { %75 = vmatpush.msra.mxu0 %v32_v18  ;;  %158 = vmatpush.msra.mxu3 %v137_v25  ;;  %v43_v38 = vld [vmem:[%s358_s1 + $0xa0] sm:$0xff]  ;;  %v42_v41 = vld [vmem:[%s358_s1 + $0x98] sm:$0xff]  ;;  %v41_v43 = vld [vmem:[%s358_s1 + $0x90] sm:$0xff] }
   0xf   :  { %95 = vmatpush.msra.mxu1 %v48_v19  ;;  %173 = vmatmul.msk.f32.vlgmr.msra.gmra.mxu2 %vm65_vm0, %v22_v28  ;;  %v133_v39 = vld [vmem:[%s362_s3] sm:$0xff]  ;;  %v24_v44 = vld [vmem:[%s358_s1 + $0x8] sm:$0xff] }
  0x10   :  { %76 = vmatpush.msra.mxu0 %v31_v22  ;;  %159 = vmatpush.msra.mxu3 %v136_v29  ;;  %v40_v45 = vld [vmem:[%s358_s1 + $0x88] sm:$0xff]  ;;  %v23_v46 = vld [vmem:[%s358_s1] sm:$0xff] }
  0x11   :  { %96 = vmatpush.msra.mxu1 %v47_v23  ;;  %62 = vperm.xlu0 %176, %v59_v33   ;;  %v39_v47 = vld [vmem:[%s358_s1 + $0x80] sm:$0xff]  ;;  %v21_v49 = vld [vmem:[%s360_s0 + $0x8] sm:$0xff] }
  0x12   :  { %77 = vmatpush.msra.mxu0 %v30_v26  ;;  %160 = vmatpush.msra.mxu3 %v135_v32  ;;  %v20_v48 = vld [vmem:[%s360_s0] sm:$0xff] }
  0x13   :  { %97 = vmatpush.msra.mxu1 %v46_v27 }
  0x14   :  { %78 = vmatpush.msra.mxu0 %v29_v30  ;;  %161 = vmatpush.msra.mxu3 %v134_v36 }
  0x15   :  { %98 = vmatpush.msra.mxu1 %v45_v31  ;;  %174 = vmatmul.msk.f32.vlgmr.msra.gmra.mxu3 %vm142_vm1, %v133_v39 }
  0x16   :  { %79 = vmatpush.msra.mxu0 %v28_v34 }
  0x17   :  { %99 = vmatpush.msra.mxu1 %v44_v35 }
  0x18   :  { %80 = vmatpush.msra.mxu0 %v27_v37 }
  0x19   :  { %100 = vmatpush.msra.mxu1 %v43_v38 }
  0x1a   :  { %81 = vmatpush.msra.mxu0 %v26_v40 }
  0x1b   :  { %101 = vmatpush.msra.mxu1 %v42_v41 }
  0x1c   :  { %82 = vmatpush.msra.mxu0 %v25_v42 }
  0x1d   :  { %102 = vmatpush.msra.mxu1 %v41_v43 }
  0x1e   :  { %83 = vmatpush.msra.mxu0 %v24_v44 }
  0x1f   :  { %103 = vmatpush.msra.mxu1 %v40_v45 }
  0x20   :  { %84 = vmatpush.msra.mxu0 %v23_v46 }
  0x21   :  { %104 = vmatpush.msra.mxu1 %v39_v47  ;;  %85 = vmatmul.f32.vlgmr.msra.gmra.mxu0 %v20_v48 }
  0x22   :  { %105 = vmatmul.f32.vlgmr.msra.gmra.mxu1 %v21_v49 }
  0x83   :  { %v63_v50 = vpop.permute.xlu0 %62 }
  0x92   :  { %v126_v54 = vpop.f32.mrf.mxu2 }
  0x98   :  { %v163_v59 = vpop.f32.mrf.mxu3 }
  0x9e   :  { %v86_v51 = vpop.f32.mrf.mxu0 }
  0x9f   :  { %v106_v52 = vpop.f32.mrf.mxu1  ;;  %v87_v53 = vadd.f32 %v86_v51, %v63_v50 }
  0xa1   :  { %v107_v55 = vadd.f32 %v106_v52, %v87_v53 }
  0xa3   :  { %v127_v56 = vadd.f32 %v126_v54, %v107_v55 }
  0xa5   :  { %v130_v57 = vmul.f32 0.2, %v127_v56  ;;  %vm129_vm2 = vcmp.ge.f32.partialorder %v127_v56, 0.0 }
  0xa7   :  { %v131_v58 = vsel %vm129_vm2, %v127_v56, %v130_v57 }
  0xa8   :  { %v132_v60 = vmul.f32 1.4142135, %v131_v58 }
  0xaa   :  { %v166_v61 = vadd.f32 %v163_v59, %v132_v60 }
  0xac   :  { %v167_v62 = vmul.f32 0.70710677, %v166_v61 }
  0xae   :  { %168 = vst [vmem:[%s363_s5] sm:$0xff] %v167_v62 }

// kernel: cifar_str_branch_forward.10
= control target key start
LH: loop header
LB: loop body
LE: loop exit
PB: predicated region body
PF: predicated region fallthrough
CT: control target
= control target key end

     0   :  { %v94_v2 = vmov 0   ;;  %vm37_vm0 = vcmask 588800   ;;  %s160_s1 = inlined_call_operand.vmem [shape: f32[72,128], index: 1, kind: input, shape index: {}]   ;;  %s161_s2 = inlined_call_operand.vmem [shape: f32[16,1], index: 2, kind: input, shape index: {}]   ;;  %s162_s0 = inlined_call_operand.vmem [shape: f32[16,72], index: 0, kind: input, shape index: {}]   ;;  %s163_s3 = inlined_call_operand.vmem [shape: f32[16,128], index: 3, kind: output, shape index: {}]  }
   0x1   :  { %v24_v0 = vld [vmem:[%s160_s1 + $0x40] sm:$0xff]  ;;  %v23_v1 = vld [vmem:[%s160_s1 + $0x38] sm:$0xff]  ;;  %93 = vset.pattern.permute.xlu0 %v94_v2  ;;  %v22_v3 = vld [vmem:[%s160_s1 + $0x30] sm:$0xff] }
   0x2   :  { %51 = vmatpush.msra.mxu0 %v24_v0  ;;  %83 = vmatpush.msra.mxu1 %v24_v0  ;;  %v25_v4 = vld [vmem:[%s161_s2] sm:$0xff]  ;;  %v21_v5 = vld [vmem:[%s160_s1 + $0x28] sm:$0xff]  ;;  %v19_v7 = vld [vmem:[%s160_s1 + $0x18] sm:$0xff] }
   0x3   :  { %29 = vperm.xlu0 %93, %v25_v4   ;;  %v20_v6 = vld [vmem:[%s160_s1 + $0x20] sm:$0xff]  ;;  %v26_v8 = vld [vmem:[%s161_s2 + $0x8] sm:$0xff]  ;;  %v18_v9 = vld [vmem:[%s160_s1 + $0x10] sm:$0xff] }
   0x4   :  { %52 = vmatpush.msra.mxu0 %v23_v1  ;;  %84 = vmatpush.msra.mxu1 %v23_v1  ;;  %v17_v10 = vld [vmem:[%s160_s1 + $0x8] sm:$0xff]  ;;  %v16_v11 = vld [vmem:[%s160_s1] sm:$0xff] }
   0x5   :  { %v14_v12 = vld [vmem:[%s162_s0] sm:$0xff]  ;;  %v15_v13 = vld [vmem:[%s162_s0 + $0x8] sm:$0xff] }
   0x6   :  { %53 = vmatpush.msra.mxu0 %v22_v3  ;;  %85 = vmatpush.msra.mxu1 %v22_v3 }
   0x8   :  { %54 = vmatpush.msra.mxu0 %v21_v5  ;;  %86 = vmatpush.msra.mxu1 %v21_v5 }
   0xa   :  { %55 = vmatpush.msra.mxu0 %v20_v6  ;;  %87 = vmatpush.msra.mxu1 %v20_v6 }
   0xb   :  { %34 = vperm.xlu0 %93, %v26_v8  }
   0xc   :  { %56 = vmatpush.msra.mxu0 %v19_v7  ;;  %88 = vmatpush.msra.mxu1 %v19_v7 }
   0xe   :  { %57 = vmatpush.msra.mxu0 %v18_v9  ;;  %89 = vmatpush.msra.mxu1 %v18_v9 }
  0x10   :  { %58 = vmatpush.msra.mxu0 %v17_v10  ;;  %90 = vmatpush.msra.mxu1 %v17_v10 }
  0x12   :  { %59 = vmatpush.msra.mxu0 %v16_v11  ;;  %91 = vmatpush.msra.mxu1 %v16_v11 }
  0x13   :  { %81 = vmatmul.msk.f32.vlgmr.msra.gmra.mxu0 %vm37_vm0, %v14_v12  ;;  %82 = vmatmul.msk.f32.vlgmr.msra.gmra.mxu1 %vm37_vm0, %v15_v13 }
  0x75   :  { %v30_v14 = vpop.permute.xlu0 %29 }
  0x7d   :  { %v35_v15 = vpop.permute.xlu0 %34 }
  0x90   :  { %v61_v16 = vpop.f32.mrf.mxu0  ;;  %v64_v17 = vpop.f32.mrf.mxu1 }
  0x91   :  { %v62_v18 = vadd.f32 %v61_v16, %v30_v14  ;;  %v65_v19 = vadd.f32 %v64_v17, %v35_v15 }
  0x93   :  { %vm67_vm1 = vcmp.ge.f32.partialorder %v62_v18, 0.0  ;;  %v69_v20 = vmul.f32 0.2, %v62_v18  ;;  %vm68_vm2 = vcmp.ge.f32.partialorder %v65_v19, 0.0  ;;  %v70_v21 = vmul.f32 0.2, %v65_v19 }
  0x95   :  { %v71_v22 = vsel %vm67_vm1, %v62_v18, %v69_v20  ;;  %v72_v23 = vsel %vm68_vm2, %v65_v19, %v70_v21 }
  0x96   :  { %v73_v24 = vmul.f32 1.4142135, %v71_v22  ;;  %v74_v25 = vmul.f32 1.4142135, %v72_v23 }
  0x98   :  { %75 = vst [vmem:[%s163_s3] sm:$0xff] %v73_v24 }
  0x99   :  { %76 = vst [vmem:[%s163_s3 + $0x8] sm:$0xff] %v74_v25 }

// kernel: cifar_str_branch_forward.11
= control target key start
LH: loop header
LB: loop body
LE: loop exit
PB: predicated region body
PF: predicated region fallthrough
CT: control target
= control target key end

     0   :  { %vm128_vm0 = vcmask 523264   ;;  %vm319_vm3 = vcmask 130048   ;;  %s803_s1 = inlined_call_operand.vmem [shape: f32[576,128], index: 1, kind: input, shape index: {}]   ;;  %s804_s0 = inlined_call_operand.vmem [shape: f32[16,576], index: 0, kind: input, shape index: {}]   ;;  %s805_s4 = inlined_call_operand.vmem [shape: f32[128,128], index: 4, kind: input, shape index: {}]   ;;  %s806_s2 = inlined_call_operand.vmem [shape: f32[16,1], index: 2, kind: input, shape index: {}]   ;;  %s807_s3 = inlined_call_operand.vmem [shape: f32[16,128], index: 3, kind: input, shape index: {}]   ;;  %s808_s6 = inlined_call_operand.vmem [shape: f32[16,1], index: 6, kind: input, shape index: {}]   ;;  %s809_s9 = inlined_call_operand.vmem [shape: f32[16,128], index: 9, kind: output, shape index: {0}]   ;;  %s810_s5 = inlined_call_operand.vmem [shape: f32[16,16], index: 5, kind: input, shape index: {}]   ;;  %s811_s8 = inlined_call_operand.vmem [shape: f32[8,1], index: 8, kind: input, shape index: {}]   ;;  %s812_s7 = inlined_call_operand.vmem [shape: f32[8,16], index: 7, kind: input, shape index: {}]   ;;  %s813_s10 = inlined_call_operand.vmem [shape: f32[8,128], index: 10, kind: output, shape index: {1}]  }
   0x1   :  { %v59_v0 = vld [vmem:[%s803_s1 + $0x78] sm:$0xff]  ;;  %v58_v2 = vld [vmem:[%s803_s1 + $0x70] sm:$0xff]  ;;  %v57_v4 = vld [vmem:[%s803_s1 + $0x68] sm:$0xff] }
   0x2   :  { %v75_v1 = vld [vmem:[%s803_s1 + $0xf8] sm:$0xff]  ;;  %135 = vmatpush.msra.mxu0 %v59_v0  ;;  %v74_v3 = vld [vmem:[%s803_s1 + $0xf0] sm:$0xff]  ;;  %v73_v5 = vld [vmem:[%s803_s1 + $0xe8] sm:$0xff] }
   0x3   :  { %158 = vmatpush.msra.mxu1 %v75_v1  ;;  %v91_v6 = vld [vmem:[%s803_s1 + $0x178] sm:$0xff]  ;;  %v90_v7 = vld [vmem:[%s803_s1 + $0x170] sm:$0xff]  ;;  %v56_v8 = vld [vmem:[%s803_s1 + $0x60] sm:$0xff] }
   0x4   :  { %136 = vmatpush.msra.mxu0 %v58_v2  ;;  %v72_v9 = vld [vmem:[%s803_s1 + $0xe0] sm:$0xff]  ;;  %181 = vmatpush.msra.mxu2 %v91_v6  ;;  %v107_v10 = vld [vmem:[%s803_s1 + $0x1f8] sm:$0xff]  ;;  %v89_v11 = vld [vmem:[%s803_s1 + $0x168] sm:$0xff] }
   0x5   :  { %159 = vmatpush.msra.mxu1 %v74_v3  ;;  %v106_v12 = vld [vmem:[%s803_s1 + $0x1f0] sm:$0xff]  ;;  %v55_v13 = vld [vmem:[%s803_s1 + $0x58] sm:$0xff]  ;;  %204 = vmatpush.msra.mxu3 %v107_v10  ;;  %v88_v15 = vld [vmem:[%s803_s1 + $0x160] sm:$0xff] }
   0x6   :  { %137 = vmatpush.msra.mxu0 %v57_v4  ;;  %v71_v14 = vld [vmem:[%s803_s1 + $0xd8] sm:$0xff]  ;;  %182 = vmatpush.msra.mxu2 %v90_v7  ;;  %v105_v16 = vld [vmem:[%s803_s1 + $0x1e8] sm:$0xff]  ;;  %v54_v17 = vld [vmem:[%s803_s1 + $0x50] sm:$0xff] }
   0x7   :  { %160 = vmatpush.msra.mxu1 %v73_v5  ;;  %v70_v18 = vld [vmem:[%s803_s1 + $0xd0] sm:$0xff]  ;;  %205 = vmatpush.msra.mxu3 %v106_v12  ;;  %v87_v19 = vld [vmem:[%s803_s1 + $0x158] sm:$0xff]  ;;  %v104_v20 = vld [vmem:[%s803_s1 + $0x1e0] sm:$0xff] }
   0x8   :  { %138 = vmatpush.msra.mxu0 %v56_v8  ;;  %183 = vmatpush.msra.mxu2 %v89_v11  ;;  %v53_v21 = vld [vmem:[%s803_s1 + $0x48] sm:$0xff]  ;;  %v86_v23 = vld [vmem:[%s803_s1 + $0x150] sm:$0xff]  ;;  %v103_v24 = vld [vmem:[%s803_s1 + $0x1d8] sm:$0xff] }
   0x9   :  { %161 = vmatpush.msra.mxu1 %v72_v9  ;;  %v69_v22 = vld [vmem:[%s803_s1 + $0xc8] sm:$0xff]  ;;  %206 = vmatpush.msra.mxu3 %v105_v16  ;;  %v52_v25 = vld [vmem:[%s803_s1 + $0x40] sm:$0xff]  ;;  %v102_v28 = vld [vmem:[%s803_s1 + $0x1d0] sm:$0xff] }
   0xa   :  { %139 = vmatpush.msra.mxu0 %v55_v13  ;;  %184 = vmatpush.msra.mxu2 %v88_v15  ;;  %v68_v26 = vld [vmem:[%s803_s1 + $0xc0] sm:$0xff]  ;;  %v85_v27 = vld [vmem:[%s803_s1 + $0x148] sm:$0xff]  ;;  %v51_v29 = vld [vmem:[%s803_s1 + $0x38] sm:$0xff] }
   0xb   :  { %162 = vmatpush.msra.mxu1 %v71_v14  ;;  %207 = vmatpush.msra.mxu3 %v104_v20  ;;  %v67_v30 = vld [vmem:[%s803_s1 + $0xb8] sm:$0xff]  ;;  %v84_v31 = vld [vmem:[%s803_s1 + $0x140] sm:$0xff]  ;;  %v101_v32 = vld [vmem:[%s803_s1 + $0x1c8] sm:$0xff] }
   0xc   :  { %140 = vmatpush.msra.mxu0 %v54_v17  ;;  %185 = vmatpush.msra.mxu2 %v87_v19  ;;  %v50_v33 = vld [vmem:[%s803_s1 + $0x30] sm:$0xff]  ;;  %v83_v35 = vld [vmem:[%s803_s1 + $0x138] sm:$0xff]  ;;  %v100_v36 = vld [vmem:[%s803_s1 + $0x1c0] sm:$0xff] }
   0xd   :  { %163 = vmatpush.msra.mxu1 %v70_v18  ;;  %208 = vmatpush.msra.mxu3 %v103_v24  ;;  %v66_v34 = vld [vmem:[%s803_s1 + $0xb0] sm:$0xff]  ;;  %v49_v37 = vld [vmem:[%s803_s1 + $0x28] sm:$0xff]  ;;  %v99_v40 = vld [vmem:[%s803_s1 + $0x1b8] sm:$0xff]  ;;  %v409_v18 = vmov 0  }
   0xe   :  { %141 = vmatpush.msra.mxu0 %v53_v21  ;;  %186 = vmatpush.msra.mxu2 %v86_v23  ;;  %v65_v38 = vld [vmem:[%s803_s1 + $0xa8] sm:$0xff]  ;;  %v82_v39 = vld [vmem:[%s803_s1 + $0x130] sm:$0xff]  ;;  %v48_v41 = vld [vmem:[%s803_s1 + $0x20] sm:$0xff] }
   0xf   :  { %164 = vmatpush.msra.mxu1 %v69_v22  ;;  %209 = vmatpush.msra.mxu3 %v102_v28  ;;  %v64_v42 = vld [vmem:[%s803_s1 + $0xa0] sm:$0xff]  ;;  %v81_v43 = vld [vmem:[%s803_s1 + $0x128] sm:$0xff]  ;;  %v98_v44 = vld [vmem:[%s803_s1 + $0x1b0] sm:$0xff] }
  0x10   :  { %142 = vmatpush.msra.mxu0 %v52_v25  ;;  %187 = vmatpush.msra.mxu2 %v85_v27  ;;  %v47_v45 = vld [vmem:[%s803_s1 + $0x18] sm:$0xff]  ;;  %v80_v47 = vld [vmem:[%s803_s1 + $0x120] sm:$0xff]  ;;  %v97_v48 = vld [vmem:[%s803_s1 + $0x1a8] sm:$0xff] }
  0x11   :  { %165 = vmatpush.msra.mxu1 %v68_v26  ;;  %210 = vmatpush.msra.mxu3 %v101_v32  ;;  %v63_v46 = vld [vmem:[%s803_s1 + $0x98] sm:$0xff]  ;;  %v46_v49 = vld [vmem:[%s803_s1 + $0x10] sm:$0xff]  ;;  %v96_v52 = vld [vmem:[%s803_s1 + $0x1a0] sm:$0xff] }
  0x12   :  { %143 = vmatpush.msra.mxu0 %v51_v29  ;;  %188 = vmatpush.msra.mxu2 %v84_v31  ;;  %v62_v50 = vld [vmem:[%s803_s1 + $0x90] sm:$0xff]  ;;  %v79_v51 = vld [vmem:[%s803_s1 + $0x118] sm:$0xff]  ;;  %v45_v53 = vld [vmem:[%s803_s1 + $0x8] sm:$0xff] }
  0x13   :  { %166 = vmatpush.msra.mxu1 %v67_v30  ;;  %211 = vmatpush.msra.mxu3 %v100_v36  ;;  %v61_v54 = vld [vmem:[%s803_s1 + $0x88] sm:$0xff]  ;;  %v78_v55 = vld [vmem:[%s803_s1 + $0x110] sm:$0xff]  ;;  %v95_v56 = vld [vmem:[%s803_s1 + $0x198] sm:$0xff] }
  0x14   :  { %144 = vmatpush.msra.mxu0 %v50_v33  ;;  %189 = vmatpush.msra.mxu2 %v83_v35  ;;  %v44_v57 = vld [vmem:[%s803_s1] sm:$0xff]  ;;  %v275_v60 = vld [vmem:[%s805_s4 + $0x78] sm:$0xff]  ;;  %v77_v62 = vld [vmem:[%s803_s1 + $0x108] sm:$0xff] }
  0x15   :  { %167 = vmatpush.msra.mxu1 %v66_v34  ;;  %212 = vmatpush.msra.mxu3 %v99_v40  ;;  %v60_v58 = vld [vmem:[%s803_s1 + $0x80] sm:$0xff]  ;;  %v115_v61 = vld [vmem:[%s803_s1 + $0x238] sm:$0xff]  ;;  %v274_v63 = vld [vmem:[%s805_s4 + $0x70] sm:$0xff] }
  0x16   :  { %145 = vmatpush.msra.mxu0 %v49_v37  ;;  %190 = vmatpush.msra.mxu2 %v82_v39  ;;  %v34_v59 = vld [vmem:[%s804_s0] sm:$0xff]  ;;  %v94_v0 = vld [vmem:[%s803_s1 + $0x190] sm:$0xff]  ;;  %v273_v3 = vld [vmem:[%s805_s4 + $0x68] sm:$0xff] }
  0x17   :  { %168 = vmatpush.msra.mxu1 %v65_v38  ;;  %213 = vmatpush.msra.mxu3 %v98_v44  ;;  %v114_v1 = vld [vmem:[%s803_s1 + $0x230] sm:$0xff]  ;;  %v76_v2 = vld [vmem:[%s803_s1 + $0x100] sm:$0xff]  ;;  %v93_v4 = vld [vmem:[%s803_s1 + $0x188] sm:$0xff] }
  0x18   :  { %146 = vmatpush.msra.mxu0 %v48_v41  ;;  %191 = vmatpush.msra.mxu2 %v81_v43  ;;  %v113_v5 = vld [vmem:[%s803_s1 + $0x228] sm:$0xff]  ;;  %v36_v6 = vld [vmem:[%s804_s0 + $0x10] sm:$0xff]  ;;  %v272_v7 = vld [vmem:[%s805_s4 + $0x60] sm:$0xff] }
  0x19   :  { %169 = vmatpush.msra.mxu1 %v64_v42  ;;  %214 = vmatpush.msra.mxu3 %v97_v48  ;;  %v92_v8 = vld [vmem:[%s803_s1 + $0x180] sm:$0xff]  ;;  %v37_v10 = vld [vmem:[%s804_s0 + $0x18] sm:$0xff]  ;;  %v39_v11 = vld [vmem:[%s804_s0 + $0x28] sm:$0xff] }
  0x1a   :  { %147 = vmatpush.msra.mxu0 %v47_v45  ;;  %192 = vmatpush.msra.mxu2 %v80_v47  ;;  %v112_v9 = vld [vmem:[%s803_s1 + $0x220] sm:$0xff]  ;;  %v271_v12 = vld [vmem:[%s805_s4 + $0x58] sm:$0xff]  ;;  %v35_v14 = vld [vmem:[%s804_s0 + $0x8] sm:$0xff] }
  0x1b   :  { %170 = vmatpush.msra.mxu1 %v63_v46  ;;  %215 = vmatpush.msra.mxu3 %v96_v52  ;;  %v111_v13 = vld [vmem:[%s803_s1 + $0x218] sm:$0xff]  ;;  %v117_v15 = vld [vmem:[%s806_s2 + $0x8] sm:$0xff]  ;;  %v270_v16 = vld [vmem:[%s805_s4 + $0x50] sm:$0xff] }
  0x1c   :  { %148 = vmatpush.msra.mxu0 %v46_v49  ;;  %193 = vmatpush.msra.mxu2 %v79_v51  ;;  %v110_v17 = vld [vmem:[%s803_s1 + $0x210] sm:$0xff]  ;;  %v269_v19 = vld [vmem:[%s805_s4 + $0x48] sm:$0xff]  ;;  %v41_v21 = vld [vmem:[%s804_s0 + $0x38] sm:$0xff] }
  0x1d   :  { %171 = vmatpush.msra.mxu1 %v62_v50  ;;  %216 = vmatpush.msra.mxu3 %v95_v56  ;;  %v109_v20 = vld [vmem:[%s803_s1 + $0x208] sm:$0xff]  ;;  %v268_v22 = vld [vmem:[%s805_s4 + $0x40] sm:$0xff]  ;;  %v267_v26 = vld [vmem:[%s805_s4 + $0x38] sm:$0xff] }
  0x1e   :  { %149 = vmatpush.msra.mxu0 %v45_v53  ;;  %194 = vmatpush.msra.mxu2 %v78_v55  ;;  %v108_v23 = vld [vmem:[%s803_s1 + $0x200] sm:$0xff]  ;;  %v40_v27 = vld [vmem:[%s804_s0 + $0x30] sm:$0xff]  ;;  %v265_v30 = vld [vmem:[%s805_s4 + $0x28] sm:$0xff] }
  0x1f   :  { %172 = vmatpush.msra.mxu1 %v61_v54  ;;  %217 = vmatpush.msra.mxu3 %v94_v0  ;;  %v42_v24 = vld [vmem:[%s804_s0 + $0x40] sm:$0xff]  ;;  %v266_v29 = vld [vmem:[%s805_s4 + $0x30] sm:$0xff]  ;;  %v43_v32 = vld [vmem:[%s804_s0 + $0x48] sm:$0xff] }
  0x20   :  { %150 = vmatpush.msra.mxu0 %v44_v57  ;;  %195 = vmatpush.msra.mxu2 %v77_v62  ;;  %v38_v25 = vld [vmem:[%s804_s0 + $0x20] sm:$0xff]  ;;  %v263_v33 = vld [vmem:[%s805_s4 + $0x18] sm:$0xff]  ;;  %v262_v34 = vld [vmem:[%s805_s4 + $0x10] sm:$0xff] }
  0x21   :  { %173 = vmatpush.msra.mxu1 %v60_v58  ;;  %151 = vmatmul.f32.vlgmr.msra.gmra.mxu0 %v34_v59  ;;  %v116_v28 = vld [vmem:[%s806_s2] sm:$0xff]  ;;  %v261_v35 = vld [vmem:[%s805_s4 + $0x8] sm:$0xff] }
  0x22   :  { %235 = vmatpush.msrb.mxu0 %v115_v61  ;;  %196 = vmatpush.msra.mxu2 %v76_v2  ;;  %v264_v31 = vld [vmem:[%s805_s4 + $0x20] sm:$0xff]  ;;  %v259_v38 = vld [vmem:[%s807_s3 + $0x8] sm:$0xff] }
  0x23   :  { %276 = vmatpush.msrb.mxu1 %v275_v60  ;;  %218 = vmatpush.msra.mxu3 %v93_v4  ;;  %v260_v36 = vld [vmem:[%s805_s4] sm:$0xff]  ;;  %v308_v60 = vld [vmem:[%s808_s6 + $0x8] sm:$0xff] }
  0x24   :  { %236 = vmatpush.msrb.mxu0 %v114_v1  ;;  %197 = vmatmul.f32.vlgmr.msra.gmra.mxu2 %v36_v6  ;;  %v258_v37 = vld [vmem:[%s807_s3] sm:$0xff] }
  0x25   :  { %277 = vmatpush.msrb.mxu1 %v274_v63  ;;  %219 = vmatpush.msra.mxu3 %v92_v8  ;;  %v307_v0 = vld [vmem:[%s808_s6] sm:$0xff] }
  0x26   :  { %237 = vmatpush.msrb.mxu0 %v113_v5  ;;  %220 = vmatmul.f32.vlgmr.msra.gmra.mxu3 %v37_v10 }
  0x27   :  { %278 = vmatpush.msrb.mxu1 %v273_v3  ;;  %406 = vset.pattern.permute.xlu0 %v409_v18 }
  0x28   :  { %238 = vmatpush.msrb.mxu0 %v112_v9  ;;  %174 = vmatmul.f32.vlgmr.msra.gmra.mxu1 %v35_v14 }
  0x29   :  { %279 = vmatpush.msrb.mxu1 %v272_v7  ;;  %154 = vmatmul.f32.gmra.mxu0 %v39_v11  ;;  %v305_v11 = vld [vmem:[%s810_s5] sm:$0xff] }
  0x2a   :  { %239 = vmatpush.msrb.mxu0 %v111_v13  ;;  %125 = vperm.xlu0 %406, %v117_v15   ;;  %v358_v13 = vld [vmem:[%s811_s8] sm:$0xff] }
  0x2b   :  { %280 = vmatpush.msrb.mxu1 %v271_v12  ;;  %407 = vset.pattern.permute.xlu1 %v409_v18  ;;  %v306_v12 = vld [vmem:[%s810_s5 + $0x8] sm:$0xff] }
  0x2c   :  { %240 = vmatpush.msrb.mxu0 %v110_v17  ;;  %408 = vset.pattern.permute.xlu2 %v409_v18 }
  0x2d   :  { %281 = vmatpush.msrb.mxu1 %v270_v16  ;;  %200 = vmatmul.f32.gmra.mxu2 %v41_v21 }
  0x2e   :  { %241 = vmatpush.msrb.mxu0 %v109_v20  ;;  %223 = vmatmul.f32.gmra.mxu3 %v42_v24 }
  0x2f   :  { %282 = vmatpush.msrb.mxu1 %v269_v19  ;;  %316 = vperm.xlu1 %407, %v308_v60  }
  0x30   :  { %242 = vmatpush.msrb.mxu0 %v108_v23  ;;  %177 = vmatmul.f32.gmra.mxu1 %v40_v27 }
  0x31   :  { %283 = vmatpush.msrb.mxu1 %v268_v22  ;;  %400 = vmatmul.msk.f32.vlgmr.msrb.gmra.mxu0 %vm128_vm0, %v38_v25 }
  0x32   :  { %120 = vperm.xlu0 %406, %v116_v28   ;;  %361 = vperm.xlu2 %408, %v358_v13  }
  0x33   :  { %284 = vmatpush.msrb.mxu1 %v267_v26  ;;  %v357_v26 = vld [vmem:[%s812_s7] sm:$0xff] }
  0x35   :  { %285 = vmatpush.msrb.mxu1 %v266_v29 }
  0x37   :  { %286 = vmatpush.msrb.mxu1 %v265_v30  ;;  %311 = vperm.xlu1 %407, %v307_v0  }
  0x39   :  { %287 = vmatpush.msrb.mxu1 %v264_v31  ;;  %401 = vmatmul.msk.f32.gmra.mxu0 %vm128_vm0, %v43_v32 }
  0x3b   :  { %288 = vmatpush.msrb.mxu1 %v263_v33 }
  0x3d   :  { %289 = vmatpush.msrb.mxu1 %v262_v34 }
  0x3f   :  { %290 = vmatpush.msrb.mxu1 %v261_v35 }
  0x41   :  { %291 = vmatpush.msrb.mxu1 %v260_v36 }
  0x42   :  { %292 = vmatmul.f32.vlgmr.msrb.gmra.mxu1 %v258_v37 }
  0x4a   :  { %295 = vmatmul.f32.gmra.mxu1 %v259_v38 }
  0x8c   :  { %v362_v27 = vpop.permute.xlu2 %361 }
  0x9c   :  { %v126_v39 = vpop.permute.xlu0 %125 }
  0x9e   :  { %v152_v40 = vpop.f32.mrf.mxu0 }
  0xa1   :  { %v317_v14 = vpop.permute.xlu1 %316 }
  0xa4   :  { %v121_v41 = vpop.permute.xlu0 %120 }
  0xa5   :  { %v153_v42 = vadd.f32 %v152_v40, %v121_v41  ;;  %v175_v44 = vpop.f32.mrf.mxu1 }
  0xa6   :  { %v155_v43 = vpop.f32.mrf.mxu0 }
  0xa7   :  { %v176_v45 = vadd.f32 %v175_v44, %v153_v42  ;;  %v198_v46 = vpop.f32.mrf.mxu2  ;;  %v156_v49 = vadd.f32 %v155_v43, %v126_v39 }
  0xa9   :  { %v199_v47 = vadd.f32 %v198_v46, %v176_v45  ;;  %v221_v48 = vpop.f32.mrf.mxu3  ;;  %v312_v16 = vpop.permute.xlu1 %311 }
  0xab   :  { %v222_v50 = vadd.f32 %v221_v48, %v199_v47 }
  0xad   :  { %v178_v52 = vpop.f32.mrf.mxu1 }
  0xae   :  { %v244_v51 = vpop.f32.mrf.mxu0  ;;  %v179_v53 = vadd.f32 %v178_v52, %v156_v49 }
  0xaf   :  { %v245_v54 = vadd.f32 %v244_v51, %v222_v50 }
  0xb0   :  { %v201_v55 = vpop.f32.mrf.mxu2 }
  0xb1   :  { %v202_v56 = vadd.f32 %v201_v55, %v179_v53  ;;  %v224_v57 = vpop.f32.mrf.mxu3  ;;  %v252_v58 = vmul.f32 0.2, %v245_v54  ;;  %vm250_vm1 = vcmp.ge.f32.partialorder %v245_v54, 0.0 }
  0xb3   :  { %v225_v59 = vadd.f32 %v224_v57, %v202_v56  ;;  %v254_v63 = vsel %vm250_vm1, %v245_v54, %v252_v58 }
  0xb4   :  { %v256_v1 = vmul.f32 1.4142135, %v254_v63 }
  0xb6   :  { %v247_v61 = vpop.f32.mrf.mxu0 }
  0xb7   :  { %v248_v62 = vadd.f32 %v247_v61, %v225_v59 }
  0xb9   :  { %v253_v2 = vmul.f32 0.2, %v248_v62  ;;  %vm251_vm2 = vcmp.ge.f32.partialorder %v248_v62, 0.0 }
  0xbb   :  { %v255_v6 = vsel %vm251_vm2, %v248_v62, %v253_v2 }
  0xbc   :  { %v257_v7 = vmul.f32 1.4142135, %v255_v6 }
  0xbf   :  { %v293_v3 = vpop.f32.mrf.mxu1 }
  0xc0   :  { %v299_v4 = vadd.f32 %v293_v3, %v256_v1 }
  0xc2   :  { %v301_v5 = vmul.f32 0.70710677, %v299_v4 }
  0xc4   :  { %303 = vst [vmem:[%s809_s9] sm:$0xff] %v301_v5 }
  0xc7   :  { %v296_v8 = vpop.f32.mrf.mxu1 }
  0xc8   :  { %v300_v9 = vadd.f32 %v296_v8, %v257_v7 }
  0xca   :  { %v302_v10 = vmul.f32 0.70710677, %v300_v9 }
  0xcc   :  { %304 = vst [vmem:[%s809_s9 + $0x8] sm:$0xff] %v302_v10  ;;  %340 = vmatpush.msrb.mxu2 %v302_v10 }
  0xce   :  { %341 = vmatpush.msrb.mxu2 %v301_v5 }
  0xcf   :  { %402 = vmatmul.msk.f32.vlgmr.msrb.gmra.mxu2 %vm319_vm3, %v305_v11 }
  0xd7   :  { %403 = vmatmul.msk.f32.gmra.mxu2 %vm319_vm3, %v306_v12 }
 0x152   :  { %v343_v15 = vpop.f32.mrf.mxu2 }
 0x153   :  { %v344_v17 = vadd.f32 %v343_v15, %v312_v16 }
 0x155   :  { %v351_v19 = vmul.f32 0.2, %v344_v17  ;;  %vm349_vm4 = vcmp.ge.f32.partialorder %v344_v17, 0.0 }
 0x157   :  { %v353_v23 = vsel %vm349_vm4, %v344_v17, %v351_v19 }
 0x158   :  { %v355_v25 = vmul.f32 1.4142135, %v353_v23 }
 0x15a   :  { %v346_v18 = vpop.f32.mrf.mxu2 }
 0x15b   :  { %v347_v20 = vadd.f32 %v346_v18, %v317_v14 }
 0x15d   :  { %v352_v21 = vmul.f32 0.2, %v347_v20  ;;  %vm350_vm5 = vcmp.ge.f32.partialorder %v347_v20, 0.0 }
 0x15f   :  { %v354_v22 = vsel %vm350_vm5, %v347_v20, %v352_v21 }
 0x160   :  { %v356_v24 = vmul.f32 1.4142135, %v354_v22 }
 0x162   :  { %381 = vmatpush.msrb.mxu3 %v356_v24 }
 0x164   :  { %382 = vmatpush.msrb.mxu3 %v355_v25 }
 0x165   :  { %404 = vmatmul.msk.f32.vlgmr.msrb.gmra.mxu3 %vm319_vm3, %v357_v26 }
 0x1e8   :  { %v384_v28 = vpop.f32.mrf.mxu3 }
 0x1e9   :  { %v385_v29 = vadd.f32 %v384_v28, %v362_v27 }
 0x1eb   :  { %vm387_vm6 = vcmp.ge.f32.partialorder %v385_v29, 0.0  ;;  %v388_v30 = vmul.f32 0.2, %v385_v29 }
 0x1ed   :  { %v389_v31 = vsel %vm387_vm6, %v385_v29, %v388_v30 }
 0x1ee   :  { %v390_v32 = vmul.f32 1.4142135, %v389_v31 }
 0x1f0   :  { %391 = vst [vmem:[%s813_s10] sm:$0xff] %v390_v32 }

</bundles_post_ra>
